<compile_context>
chip_gen: v6e
topology: v6e:2x2x1
jax: 0.10.0
libtpu: 0.0.40
codegen_flags: <defaults>
</compile_context>

<pallas_src>
import math
import jax
import jax.numpy as jnp
from jax import lax
from jax.experimental import pallas as pl
from jax.experimental.pallas import tpu as pltpu

# ----------------------------- tiny CLIP config -----------------------------
B = 2          # batch
CIN = 3        # input channels
IMG = 16       # image size
PATCH = 8      # patch size -> 2x2 grid
GRID = IMG // PATCH
NPATCH = GRID * GRID          # 4
T = NPATCH + 1                # tokens incl. CLS = 5
BT = B * T                    # batch folded into rows = 10
WIDTH = 32                    # transformer width
HEADS = 2
DHEAD = WIDTH // HEADS
LAYERS = 2
EMBED = 16                    # CLIP joint embedding dim (visual proj output)
NCLS = 8                      # reference_feat rows == fake_head out_features
CPP = CIN * PATCH * PATCH     # flattened patch length = 192
EPS = 1e-5

F32 = jnp.float32


def _ln(x, g, b):
    mu = jnp.mean(x, axis=-1, keepdims=True)
    var = jnp.mean((x - mu) * (x - mu), axis=-1, keepdims=True)
    return (x - mu) * lax.rsqrt(var + EPS) * g + b


# ------------------------------- fused kernel -------------------------------

def fused_vit_kernel(patches_ref, convw_ref, base_ref, mask_ref,
                     lnpre_g_ref, lnpre_b_ref,
                     ln1g_ref, ln1b_ref,
                     wq_ref, wk_ref, wv_ref, bq_ref, bk_ref, bv_ref,
                     wo_ref, bo_ref,
                     ln2g_ref, ln2b_ref,
                     w1_ref, b1_ref, w2_ref, b2_ref,
                     lnpost_g_ref, lnpost_b_ref,
                     proj_ref, reft_ref, headb_ref,
                     o_ref, x_scr):
    # ---- patch embedding (conv1 as matmul; conv weight pre-transposed) ----
    tok = jnp.dot(patches_ref[...], convw_ref[...],
                  preferred_element_type=F32)                 # (B*NPATCH, W)

    # ---- assemble tokens: CLS + patch tokens + positional embedding ----
    # `base` already holds (class_emb + pos[0]) on CLS rows and pos[1:] on
    # patch rows, tiled over the batch; add the patch embeddings in place.
    x_scr[...] = base_ref[...]
    for b in range(B):
        r0 = b * T + 1
        x_scr[pl.ds(r0, NPATCH), :] = (base_ref[pl.ds(r0, NPATCH), :] +
                                       tok[b * NPATCH:(b + 1) * NPATCH, :])

    x = _ln(x_scr[...], lnpre_g_ref[...], lnpre_b_ref[...])   # (B*T, W)
    mask = mask_ref[...]                                      # (B*T, B*T)

    # ---- transformer (static unroll over layers & heads) ----
    for l in range(LAYERS):
        h = _ln(x, ln1g_ref[l], ln1b_ref[l])
        wq_l, wk_l, wv_l = wq_ref[l], wk_ref[l], wv_ref[l]
        bq_l, bk_l, bv_l = bq_ref[l], bk_ref[l], bv_ref[l]
        wo_l = wo_ref[l]
        attn = None
        for hh in range(HEADS):
            # Head weights pre-split & pre-transposed on host; 1/sqrt(d_head)
            # folded into wq/bq -> no in-kernel transposes or extra scaling.
            q = jnp.dot(h, wq_l[hh], preferred_element_type=F32) + bq_l[hh]
            k = jnp.dot(h, wk_l[hh], preferred_element_type=F32) + bk_l[hh]
            v = jnp.dot(h, wv_l[hh], preferred_element_type=F32) + bv_l[hh]
            # s[i, j] = q_i . k_j  (contract last dims; no explicit .T)
            s = lax.dot_general(q, k, (((1,), (1,)), ((), ())),
                                preferred_element_type=F32) + mask
            s = s - jnp.max(s, axis=-1, keepdims=True)
            p = jnp.exp(s)
            p = p * pl.reciprocal(jnp.sum(p, axis=-1, keepdims=True),
                                  approx=True)
            ctx = jnp.dot(p, v, preferred_element_type=F32)   # (B*T, Dh)
            # out-projection distributes over head concat -> accumulate.
            part = jnp.dot(ctx, wo_l[hh], preferred_element_type=F32)
            attn = part if attn is None else attn + part
        x = x + attn + bo_ref[l]

        # ---- MLP with QuickGELU (x * sigmoid(1.702 x)), CLIP-style ----
        h2 = _ln(x, ln2g_ref[l], ln2b_ref[l])
        m = jnp.dot(h2, w1_ref[l], preferred_element_type=F32) + b1_ref[l]
        m = m * jax.nn.sigmoid(1.702 * m)
        x = x + jnp.dot(m, w2_ref[l], preferred_element_type=F32) + b2_ref[l]

    # ---- head: ln_post on CLS rows -> visual projection -> fake_head ----
    cls_rows = jnp.concatenate([x[b * T:b * T + 1, :] for b in range(B)],
                               axis=0)                        # (B, W)
    feat = jnp.dot(_ln(cls_rows, lnpost_g_ref[...], lnpost_b_ref[...]),
                   proj_ref[...], preferred_element_type=F32)  # (B, EMBED)
    o_ref[...] = (jnp.dot(feat, reft_ref[...], preferred_element_type=F32)
                  + headb_ref[...])                            # (B, NCLS)


# ------------------------------ pallas wrapper -------------------------------

def _full_spec(shape):
    return pl.BlockSpec(shape, lambda *_, n=len(shape): (0,) * n)


ARG_ORDER = ("patches", "conv_w_t", "base", "mask", "ln_pre_g", "ln_pre_b",
             "ln1_g", "ln1_b", "wq", "wk", "wv", "bq", "bk", "bv",
             "wo", "bo", "ln2_g", "ln2_b", "w1", "b1", "w2", "b2",
             "ln_post_g", "ln_post_b", "proj", "ref_t", "head_b")


def fused_forward(patches, prep):
    args = (patches,) + tuple(prep[k] for k in ARG_ORDER[1:])
    return pl.pallas_call(
        fused_vit_kernel,
        out_shape=jax.ShapeDtypeStruct((B, NCLS), F32),
        in_specs=[_full_spec(a.shape) for a in args],
        out_specs=_full_spec((B, NCLS)),
        scratch_shapes=[pltpu.VMEM((BT, WIDTH), F32)],
    )(*args)


# ------------------------------ forward (glue) ------------------------------

def extract_patches(x):
    # x: [B, C, H, W] (NCHW). Row ordering (c, u, v) matches
    # torch Conv2d weight [width, C, ps, ps].reshape(width, -1).
    x = x.reshape(B, CIN, GRID, PATCH, GRID, PATCH)
    x = x.transpose(0, 2, 4, 1, 3, 5)              # B, gh, gw, C, ps, ps
    return x.reshape(B * NPATCH, CPP)


def visual_wrapper_forward(x, prep):
    patches = extract_patches(x)                   # pure layout glue (XLA)
    return fused_forward(patches, prep)


# --------------------------- deterministic params ----------------------------

def init_params(key):
    """PyTorch-layout parameters (same layout/semantics as the nn.Module)."""
    ks = iter(jax.random.split(key, 64))

    def rnd(shape, scale=0.02):
        return (jax.random.normal(next(ks), shape, dtype=F32) * scale).astype(F32)

    params = {
        "conv_w": rnd((WIDTH, CPP)),                   # flattened conv1 weight
        "class_emb": rnd((WIDTH,)),
        "pos": rnd((T, WIDTH)),
        "ln_pre_g": jnp.ones((WIDTH,), F32),
        "ln_pre_b": jnp.zeros((WIDTH,), F32),
        "ln_post_g": jnp.ones((WIDTH,), F32),
        "ln_post_b": jnp.zeros((WIDTH,), F32),
        "proj": rnd((WIDTH, EMBED)),
        "ref_feat": rnd((NCLS, EMBED), scale=0.1),     # reference text features
        "head_b": rnd((NCLS,), scale=0.01),            # fake_head bias
        "layers": [],
    }
    for _ in range(LAYERS):
        params["layers"].append({
            "ln1_g": jnp.ones((WIDTH,), F32), "ln1_b": jnp.zeros((WIDTH,), F32),
            "wqkv": rnd((3 * WIDTH, WIDTH)), "bqkv": jnp.zeros((3 * WIDTH,), F32),
            "wo": rnd((WIDTH, WIDTH)), "bo": jnp.zeros((WIDTH,), F32),
            "ln2_g": jnp.ones((WIDTH,), F32), "ln2_b": jnp.zeros((WIDTH,), F32),
            "w1": rnd((4 * WIDTH, WIDTH)), "b1": jnp.zeros((4 * WIDTH,), F32),
            "w2": rnd((WIDTH, 4 * WIDTH)), "b2": jnp.zeros((WIDTH,), F32),
        })
    return params


def prepare_params(params):
    """One-time host-side prep: transpose / head-split / stack weights so the
    kernel never transposes, never lane-slices activations, and never
    re-broadcasts 1-D vectors."""
    scale = 1.0 / math.sqrt(DHEAD)
    prep = {
        "conv_w_t": params["conv_w"].T,                    # (CPP, W)
        "ln_pre_g": params["ln_pre_g"].reshape(1, WIDTH),
        "ln_pre_b": params["ln_pre_b"].reshape(1, WIDTH),
        "ln_post_g": params["ln_post_g"].reshape(1, WIDTH),
        "ln_post_b": params["ln_post_b"].reshape(1, WIDTH),
        "proj": params["proj"],                            # (W, EMBED)
        "ref_t": params["ref_feat"].T,                     # (EMBED, NCLS)
        "head_b": params["head_b"].reshape(1, NCLS),
    }
    # CLS token + positional embedding, pre-tiled over the batch.
    per_img = jnp.concatenate(
        [(params["class_emb"] + params["pos"][0])[None, :], params["pos"][1:]],
        axis=0)                                            # (T, W)
    prep["base"] = jnp.tile(per_img, (B, 1))               # (B*T, W)
    # Block-diagonal batch mask: one attention matmul covers the whole batch.
    ids = jnp.arange(BT) // T
    prep["mask"] = jnp.where(ids[:, None] == ids[None, :],
                             0.0, -1e30).astype(F32)       # (B*T, B*T)

    def split_heads_in(wt):      # (W_in, W_out=W) -> (H, W_in, DHEAD)
        return wt.reshape(WIDTH, HEADS, DHEAD).transpose(1, 0, 2)

    keys = ("ln1_g", "ln1_b", "wq", "wk", "wv", "bq", "bk", "bv",
            "wo", "bo", "ln2_g", "ln2_b", "w1", "b1", "w2", "b2")
    stacks = {k: [] for k in keys}
    for lp in params["layers"]:
        wqkv, bqkv = lp["wqkv"], lp["bqkv"]                # (3W, W), (3W,)
        wq_t = wqkv[0 * WIDTH:1 * WIDTH].T                 # (W, W)
        wk_t = wqkv[1 * WIDTH:2 * WIDTH].T
        wv_t = wqkv[2 * WIDTH:3 * WIDTH].T
        stacks["wq"].append(split_heads_in(wq_t) * scale)  # fold 1/sqrt(d)
        stacks["wk"].append(split_heads_in(wk_t))
        stacks["wv"].append(split_heads_in(wv_t))
        stacks["bq"].append(bqkv[0 * WIDTH:1 * WIDTH].reshape(HEADS, 1, DHEAD) * scale)
        stacks["bk"].append(bqkv[1 * WIDTH:2 * WIDTH].reshape(HEADS, 1, DHEAD))
        stacks["bv"].append(bqkv[2 * WIDTH:3 * WIDTH].reshape(HEADS, 1, DHEAD))
        stacks["wo"].append(lp["wo"].T.reshape(HEADS, DHEAD, WIDTH))
        stacks["bo"].append(lp["bo"].reshape(1, WIDTH))
        stacks["ln1_g"].append(lp["ln1_g"].reshape(1, WIDTH))
        stacks["ln1_b"].append(lp["ln1_b"].reshape(1, WIDTH))
        stacks["ln2_g"].append(lp["ln2_g"].reshape(1, WIDTH))
        stacks["ln2_b"].append(lp["ln2_b"].reshape(1, WIDTH))
        stacks["w1"].append(lp["w1"].T)                    # (W, 4W)
        stacks["b1"].append(lp["b1"].reshape(1, 4 * WIDTH))
        stacks["w2"].append(lp["w2"].T)                    # (4W, W)
        stacks["b2"].append(lp["b2"].reshape(1, WIDTH))
    for k, v in stacks.items():
        prep[k] = jnp.stack(v, axis=0)                     # leading LAYERS dim
    return prep


if __name__ == "__main__":
    key = jax.random.PRNGKey(0)
    pkey, xkey = jax.random.split(key)
    params = init_params(pkey)
    prep = prepare_params(params)          # one-time host-side weight prep
    x = jax.random.normal(xkey, (B, CIN, IMG, IMG), dtype=F32)  # NCHW input

    out = visual_wrapper_forward(x, prep)
    out = jax.block_until_ready(out)

    assert out.shape == (B, NCLS), out.shape
    assert bool(jnp.all(jnp.isfinite(out)))
    print("KERNEL_OK")
</pallas_src>

<mosaic_0001>
module attributes {stable_mosaic.version = 11 : i64} {
  func.func @fused_vit_kernel(%arg0: memref<8x192xf32, #tpu.memory_space<vmem>>, %arg1: memref<192x32xf32, #tpu.memory_space<vmem>>, %arg2: memref<10x32xf32, #tpu.memory_space<vmem>>, %arg3: memref<10x10xf32, #tpu.memory_space<vmem>>, %arg4: memref<1x32xf32, #tpu.memory_space<vmem>>, %arg5: memref<1x32xf32, #tpu.memory_space<vmem>>, %arg6: memref<2x1x32xf32, #tpu.memory_space<vmem>>, %arg7: memref<2x1x32xf32, #tpu.memory_space<vmem>>, %arg8: memref<2x2x32x16xf32, #tpu.memory_space<vmem>>, %arg9: memref<2x2x32x16xf32, #tpu.memory_space<vmem>>, %arg10: memref<2x2x32x16xf32, #tpu.memory_space<vmem>>, %arg11: memref<2x2x1x16xf32, #tpu.memory_space<vmem>>, %arg12: memref<2x2x1x16xf32, #tpu.memory_space<vmem>>, %arg13: memref<2x2x1x16xf32, #tpu.memory_space<vmem>>, %arg14: memref<2x2x16x32xf32, #tpu.memory_space<vmem>>, %arg15: memref<2x1x32xf32, #tpu.memory_space<vmem>>, %arg16: memref<2x1x32xf32, #tpu.memory_space<vmem>>, %arg17: memref<2x1x32xf32, #tpu.memory_space<vmem>>, %arg18: memref<2x32x128xf32, #tpu.memory_space<vmem>>, %arg19: memref<2x1x128xf32, #tpu.memory_space<vmem>>, %arg20: memref<2x128x32xf32, #tpu.memory_space<vmem>>, %arg21: memref<2x1x32xf32, #tpu.memory_space<vmem>>, %arg22: memref<1x32xf32, #tpu.memory_space<vmem>>, %arg23: memref<1x32xf32, #tpu.memory_space<vmem>>, %arg24: memref<32x16xf32, #tpu.memory_space<vmem>>, %arg25: memref<16x8xf32, #tpu.memory_space<vmem>>, %arg26: memref<1x8xf32, #tpu.memory_space<vmem>>, %arg27: memref<2x8xf32, #tpu.memory_space<vmem>>, %arg28: memref<10x32xf32, #tpu.memory_space<vmem>>) attributes {dimension_semantics = [], scalar_prefetch = 0 : i64, scratch_operands = 1 : i64, tpu.core_type = #tpu.core_type<tc>} {
    %c0 = arith.constant 0 : index
    %c0_0 = arith.constant 0 : index
    %0 = vector.load %arg0[%c0, %c0_0] : memref<8x192xf32, #tpu.memory_space<vmem>>, vector<8x192xf32>
    %c0_1 = arith.constant 0 : index
    %c0_2 = arith.constant 0 : index
    %1 = vector.load %arg1[%c0_1, %c0_2] : memref<192x32xf32, #tpu.memory_space<vmem>>, vector<192x32xf32>
    %cst = arith.constant dense<0.000000e+00> : vector<8x32xf32>
    %2 = tpu.matmul %0, %1, %cst {dimension_numbers = #tpu.dot_dimension_numbers<[1], [0], [0], [1], [0, 0, 1, 1], [], []>} : vector<8x192xf32>, vector<192x32xf32>, vector<8x32xf32> -> vector<8x32xf32>
    %c0_3 = arith.constant 0 : index
    %c0_4 = arith.constant 0 : index
    %3 = vector.load %arg2[%c0_3, %c0_4] : memref<10x32xf32, #tpu.memory_space<vmem>>, vector<10x32xf32>
    %c0_5 = arith.constant 0 : index
    %c0_6 = arith.constant 0 : index
    %4 = vector.load %arg28[%c0_5, %c0_6] : memref<10x32xf32, #tpu.memory_space<vmem>>, vector<10x32xf32>
    tpu.vector_store %arg28[%c0_5, %c0_6], %3 {strides = array<i32>} : memref<10x32xf32, #tpu.memory_space<vmem>>, vector<10x32xf32>,
    %c1 = arith.constant 1 : index
    %c0_7 = arith.constant 0 : index
    %5 = vector.load %arg2[%c1, %c0_7] : memref<10x32xf32, #tpu.memory_space<vmem>>, vector<4x32xf32>
    %6 = vector.extract_strided_slice %2 {offsets = [0, 0], sizes = [4, 32], strides = [1, 1]} : vector<8x32xf32> to vector<4x32xf32>
    %7 = arith.addf %5, %6 : vector<4x32xf32>
    %c1_8 = arith.constant 1 : index
    %c0_9 = arith.constant 0 : index
    %8 = vector.load %arg28[%c1_8, %c0_9] : memref<10x32xf32, #tpu.memory_space<vmem>>, vector<4x32xf32>
    tpu.vector_store %arg28[%c1_8, %c0_9], %7 {strides = array<i32>} : memref<10x32xf32, #tpu.memory_space<vmem>>, vector<4x32xf32>,
    %c6 = arith.constant 6 : index
    %c0_10 = arith.constant 0 : index
    %9 = vector.load %arg2[%c6, %c0_10] : memref<10x32xf32, #tpu.memory_space<vmem>>, vector<4x32xf32>
    %10 = vector.extract_strided_slice %2 {offsets = [4, 0], sizes = [4, 32], strides = [1, 1]} : vector<8x32xf32> to vector<4x32xf32>
    %11 = arith.addf %9, %10 : vector<4x32xf32>
    %c6_11 = arith.constant 6 : index
    %c0_12 = arith.constant 0 : index
    %12 = vector.load %arg28[%c6_11, %c0_12] : memref<10x32xf32, #tpu.memory_space<vmem>>, vector<4x32xf32>
    tpu.vector_store %arg28[%c6_11, %c0_12], %11 {strides = array<i32>} : memref<10x32xf32, #tpu.memory_space<vmem>>, vector<4x32xf32>,
    %c0_13 = arith.constant 0 : index
    %c0_14 = arith.constant 0 : index
    %13 = vector.load %arg28[%c0_13, %c0_14] : memref<10x32xf32, #tpu.memory_space<vmem>>, vector<10x32xf32>
    %c0_15 = arith.constant 0 : index
    %c0_16 = arith.constant 0 : index
    %14 = vector.load %arg4[%c0_15, %c0_16] : memref<1x32xf32, #tpu.memory_space<vmem>>, vector<1x32xf32>
    %c0_17 = arith.constant 0 : index
    %c0_18 = arith.constant 0 : index
    %15 = vector.load %arg5[%c0_17, %c0_18] : memref<1x32xf32, #tpu.memory_space<vmem>>, vector<1x32xf32>
    %cst_19 = arith.constant dense<0.000000e+00> : vector<10xf32>
    %16 = vector.multi_reduction <add>, %13, %cst_19 [1] : vector<10x32xf32> to vector<10xf32>
    %17 = vector.shape_cast %16 : vector<10xf32> to vector<10x1xf32>
    %cst_20 = arith.constant 3.200000e+01 : f32
    %18 = vector.broadcast %cst_20 : f32 to vector<10x1xf32>
    %19 = arith.divf %17, %18 : vector<10x1xf32>
    %20 = vector.broadcast %19 : vector<10x1xf32> to vector<10x32xf32>
    %21 = arith.subf %13, %20 : vector<10x32xf32>
    %22 = vector.broadcast %19 : vector<10x1xf32> to vector<10x32xf32>
    %23 = arith.subf %13, %22 : vector<10x32xf32>
    %24 = arith.mulf %21, %23 : vector<10x32xf32>
    %cst_21 = arith.constant dense<0.000000e+00> : vector<10xf32>
    %25 = vector.multi_reduction <add>, %24, %cst_21 [1] : vector<10x32xf32> to vector<10xf32>
    %26 = vector.shape_cast %25 : vector<10xf32> to vector<10x1xf32>
    %cst_22 = arith.constant 3.200000e+01 : f32
    %27 = vector.broadcast %cst_22 : f32 to vector<10x1xf32>
    %28 = arith.divf %26, %27 : vector<10x1xf32>
    %29 = vector.broadcast %19 : vector<10x1xf32> to vector<10x32xf32>
    %30 = arith.subf %13, %29 : vector<10x32xf32>
    %cst_23 = arith.constant 9.99999974E-6 : f32
    %31 = vector.broadcast %cst_23 : f32 to vector<10x1xf32>
    %32 = arith.addf %28, %31 : vector<10x1xf32>
    %33 = math.rsqrt %32 : vector<10x1xf32>
    %34 = vector.broadcast %33 : vector<10x1xf32> to vector<10x32xf32>
    %35 = arith.mulf %30, %34 : vector<10x32xf32>
    %36 = vector.broadcast %14 : vector<1x32xf32> to vector<10x32xf32>
    %37 = arith.mulf %35, %36 : vector<10x32xf32>
    %38 = vector.broadcast %15 : vector<1x32xf32> to vector<10x32xf32>
    %39 = arith.addf %37, %38 : vector<10x32xf32>
    %c0_24 = arith.constant 0 : index
    %c0_25 = arith.constant 0 : index
    %40 = vector.load %arg3[%c0_24, %c0_25] : memref<10x10xf32, #tpu.memory_space<vmem>>, vector<10x10xf32>
    %c0_26 = arith.constant 0 : index
    %c0_27 = arith.constant 0 : index
    %c0_28 = arith.constant 0 : index
    %41 = vector.load %arg6[%c0_26, %c0_27, %c0_28] : memref<2x1x32xf32, #tpu.memory_space<vmem>>, vector<1x1x32xf32>
    %42 = vector.shape_cast %41 : vector<1x1x32xf32> to vector<1x32xf32>
    %c0_29 = arith.constant 0 : index
    %c0_30 = arith.constant 0 : index
    %c0_31 = arith.constant 0 : index
    %43 = vector.load %arg7[%c0_29, %c0_30, %c0_31] : memref<2x1x32xf32, #tpu.memory_space<vmem>>, vector<1x1x32xf32>
    %44 = vector.shape_cast %43 : vector<1x1x32xf32> to vector<1x32xf32>
    %cst_32 = arith.constant dense<0.000000e+00> : vector<10xf32>
    %45 = vector.multi_reduction <add>, %39, %cst_32 [1] : vector<10x32xf32> to vector<10xf32>
    %46 = vector.shape_cast %45 : vector<10xf32> to vector<10x1xf32>
    %cst_33 = arith.constant 3.200000e+01 : f32
    %47 = vector.broadcast %cst_33 : f32 to vector<10x1xf32>
    %48 = arith.divf %46, %47 : vector<10x1xf32>
    %49 = vector.broadcast %48 : vector<10x1xf32> to vector<10x32xf32>
    %50 = arith.subf %39, %49 : vector<10x32xf32>
    %51 = vector.broadcast %48 : vector<10x1xf32> to vector<10x32xf32>
    %52 = arith.subf %39, %51 : vector<10x32xf32>
    %53 = arith.mulf %50, %52 : vector<10x32xf32>
    %cst_34 = arith.constant dense<0.000000e+00> : vector<10xf32>
    %54 = vector.multi_reduction <add>, %53, %cst_34 [1] : vector<10x32xf32> to vector<10xf32>
    %55 = vector.shape_cast %54 : vector<10xf32> to vector<10x1xf32>
    %cst_35 = arith.constant 3.200000e+01 : f32
    %56 = vector.broadcast %cst_35 : f32 to vector<10x1xf32>
    %57 = arith.divf %55, %56 : vector<10x1xf32>
    %58 = vector.broadcast %48 : vector<10x1xf32> to vector<10x32xf32>
    %59 = arith.subf %39, %58 : vector<10x32xf32>
    %cst_36 = arith.constant 9.99999974E-6 : f32
    %60 = vector.broadcast %cst_36 : f32 to vector<10x1xf32>
    %61 = arith.addf %57, %60 : vector<10x1xf32>
    %62 = math.rsqrt %61 : vector<10x1xf32>
    %63 = vector.broadcast %62 : vector<10x1xf32> to vector<10x32xf32>
    %64 = arith.mulf %59, %63 : vector<10x32xf32>
    %65 = vector.broadcast %42 : vector<1x32xf32> to vector<10x32xf32>
    %66 = arith.mulf %64, %65 : vector<10x32xf32>
    %67 = vector.broadcast %44 : vector<1x32xf32> to vector<10x32xf32>
    %68 = arith.addf %66, %67 : vector<10x32xf32>
    %c0_37 = arith.constant 0 : index
    %c0_38 = arith.constant 0 : index
    %c0_39 = arith.constant 0 : index
    %c0_40 = arith.constant 0 : index
    %69 = vector.load %arg8[%c0_37, %c0_38, %c0_39, %c0_40] : memref<2x2x32x16xf32, #tpu.memory_space<vmem>>, vector<1x2x32x16xf32>
    %70 = vector.shape_cast %69 : vector<1x2x32x16xf32> to vector<2x32x16xf32>
    %c0_41 = arith.constant 0 : index
    %c0_42 = arith.constant 0 : index
    %c0_43 = arith.constant 0 : index
    %c0_44 = arith.constant 0 : index
    %71 = vector.load %arg9[%c0_41, %c0_42, %c0_43, %c0_44] : memref<2x2x32x16xf32, #tpu.memory_space<vmem>>, vector<1x2x32x16xf32>
    %72 = vector.shape_cast %71 : vector<1x2x32x16xf32> to vector<2x32x16xf32>
    %c0_45 = arith.constant 0 : index
    %c0_46 = arith.constant 0 : index
    %c0_47 = arith.constant 0 : index
    %c0_48 = arith.constant 0 : index
    %73 = vector.load %arg10[%c0_45, %c0_46, %c0_47, %c0_48] : memref<2x2x32x16xf32, #tpu.memory_space<vmem>>, vector<1x2x32x16xf32>
    %74 = vector.shape_cast %73 : vector<1x2x32x16xf32> to vector<2x32x16xf32>
    %c0_49 = arith.constant 0 : index
    %c0_50 = arith.constant 0 : index
    %c0_51 = arith.constant 0 : index
    %c0_52 = arith.constant 0 : index
    %75 = vector.load %arg11[%c0_49, %c0_50, %c0_51, %c0_52] : memref<2x2x1x16xf32, #tpu.memory_space<vmem>>, vector<1x2x1x16xf32>
    %76 = vector.shape_cast %75 : vector<1x2x1x16xf32> to vector<2x1x16xf32>
    %c0_53 = arith.constant 0 : index
    %c0_54 = arith.constant 0 : index
    %c0_55 = arith.constant 0 : index
    %c0_56 = arith.constant 0 : index
    %77 = vector.load %arg12[%c0_53, %c0_54, %c0_55, %c0_56] : memref<2x2x1x16xf32, #tpu.memory_space<vmem>>, vector<1x2x1x16xf32>
    %78 = vector.shape_cast %77 : vector<1x2x1x16xf32> to vector<2x1x16xf32>
    %c0_57 = arith.constant 0 : index
    %c0_58 = arith.constant 0 : index
    %c0_59 = arith.constant 0 : index
    %c0_60 = arith.constant 0 : index
    %79 = vector.load %arg13[%c0_57, %c0_58, %c0_59, %c0_60] : memref<2x2x1x16xf32, #tpu.memory_space<vmem>>, vector<1x2x1x16xf32>
    %80 = vector.shape_cast %79 : vector<1x2x1x16xf32> to vector<2x1x16xf32>
    %c0_61 = arith.constant 0 : index
    %c0_62 = arith.constant 0 : index
    %c0_63 = arith.constant 0 : index
    %c0_64 = arith.constant 0 : index
    %81 = vector.load %arg14[%c0_61, %c0_62, %c0_63, %c0_64] : memref<2x2x16x32xf32, #tpu.memory_space<vmem>>, vector<1x2x16x32xf32>
    %82 = vector.shape_cast %81 : vector<1x2x16x32xf32> to vector<2x16x32xf32>
    %83 = vector.extract_strided_slice %70 {offsets = [0, 0, 0], sizes = [1, 32, 16], strides = [1, 1, 1]} : vector<2x32x16xf32> to vector<1x32x16xf32>
    %84 = vector.shape_cast %83 : vector<1x32x16xf32> to vector<32x16xf32>
    %cst_65 = arith.constant dense<0.000000e+00> : vector<10x16xf32>
    %85 = tpu.matmul %68, %84, %cst_65 {dimension_numbers = #tpu.dot_dimension_numbers<[1], [0], [0], [1], [0, 0, 1, 1], [], []>} : vector<10x32xf32>, vector<32x16xf32>, vector<10x16xf32> -> vector<10x16xf32>
    %86 = vector.extract_strided_slice %76 {offsets = [0, 0, 0], sizes = [1, 1, 16], strides = [1, 1, 1]} : vector<2x1x16xf32> to vector<1x1x16xf32>
    %87 = vector.shape_cast %86 : vector<1x1x16xf32> to vector<1x16xf32>
    %88 = vector.broadcast %87 : vector<1x16xf32> to vector<10x16xf32>
    %89 = arith.addf %85, %88 : vector<10x16xf32>
    %90 = vector.extract_strided_slice %72 {offsets = [0, 0, 0], sizes = [1, 32, 16], strides = [1, 1, 1]} : vector<2x32x16xf32> to vector<1x32x16xf32>
    %91 = vector.shape_cast %90 : vector<1x32x16xf32> to vector<32x16xf32>
    %cst_66 = arith.constant dense<0.000000e+00> : vector<10x16xf32>
    %92 = tpu.matmul %68, %91, %cst_66 {dimension_numbers = #tpu.dot_dimension_numbers<[1], [0], [0], [1], [0, 0, 1, 1], [], []>} : vector<10x32xf32>, vector<32x16xf32>, vector<10x16xf32> -> vector<10x16xf32>
    %93 = vector.extract_strided_slice %78 {offsets = [0, 0, 0], sizes = [1, 1, 16], strides = [1, 1, 1]} : vector<2x1x16xf32> to vector<1x1x16xf32>
    %94 = vector.shape_cast %93 : vector<1x1x16xf32> to vector<1x16xf32>
    %95 = vector.broadcast %94 : vector<1x16xf32> to vector<10x16xf32>
    %96 = arith.addf %92, %95 : vector<10x16xf32>
    %97 = vector.extract_strided_slice %74 {offsets = [0, 0, 0], sizes = [1, 32, 16], strides = [1, 1, 1]} : vector<2x32x16xf32> to vector<1x32x16xf32>
    %98 = vector.shape_cast %97 : vector<1x32x16xf32> to vector<32x16xf32>
    %cst_67 = arith.constant dense<0.000000e+00> : vector<10x16xf32>
    %99 = tpu.matmul %68, %98, %cst_67 {dimension_numbers = #tpu.dot_dimension_numbers<[1], [0], [0], [1], [0, 0, 1, 1], [], []>} : vector<10x32xf32>, vector<32x16xf32>, vector<10x16xf32> -> vector<10x16xf32>
    %100 = vector.extract_strided_slice %80 {offsets = [0, 0, 0], sizes = [1, 1, 16], strides = [1, 1, 1]} : vector<2x1x16xf32> to vector<1x1x16xf32>
    %101 = vector.shape_cast %100 : vector<1x1x16xf32> to vector<1x16xf32>
    %102 = vector.broadcast %101 : vector<1x16xf32> to vector<10x16xf32>
    %103 = arith.addf %99, %102 : vector<10x16xf32>
    %cst_68 = arith.constant dense<0.000000e+00> : vector<10x10xf32>
    %104 = tpu.matmul %89, %96, %cst_68 {dimension_numbers = #tpu.dot_dimension_numbers<[1], [1], [0], [0], [0, 0, 1, 0], [], []>} : vector<10x16xf32>, vector<10x16xf32>, vector<10x10xf32> -> vector<10x10xf32>
    %105 = arith.addf %104, %40 : vector<10x10xf32>
    %cst_69 = arith.constant dense<0xFF800000> : vector<10xf32>
    %106 = vector.multi_reduction <maximumf>, %105, %cst_69 [1] : vector<10x10xf32> to vector<10xf32>
    %107 = vector.shape_cast %106 : vector<10xf32> to vector<10x1xf32>
    %108 = vector.broadcast %107 : vector<10x1xf32> to vector<10x10xf32>
    %109 = arith.subf %105, %108 : vector<10x10xf32>
    %110 = math.exp %109 : vector<10x10xf32>
    %cst_70 = arith.constant dense<0.000000e+00> : vector<10xf32>
    %111 = vector.multi_reduction <add>, %110, %cst_70 [1] : vector<10x10xf32> to vector<10xf32>
    %112 = vector.shape_cast %111 : vector<10xf32> to vector<10x1xf32>
    %113 = tpu.reciprocal %112 {approx = true} : vector<10x1xf32> -> vector<10x1xf32>
    %114 = vector.broadcast %113 : vector<10x1xf32> to vector<10x10xf32>
    %115 = arith.mulf %110, %114 : vector<10x10xf32>
    %cst_71 = arith.constant dense<0.000000e+00> : vector<10x16xf32>
    %116 = tpu.matmul %115, %103, %cst_71 {dimension_numbers = #tpu.dot_dimension_numbers<[1], [0], [0], [1], [0, 0, 1, 1], [], []>} : vector<10x10xf32>, vector<10x16xf32>, vector<10x16xf32> -> vector<10x16xf32>
    %117 = vector.extract_strided_slice %82 {offsets = [0, 0, 0], sizes = [1, 16, 32], strides = [1, 1, 1]} : vector<2x16x32xf32> to vector<1x16x32xf32>
    %118 = vector.shape_cast %117 : vector<1x16x32xf32> to vector<16x32xf32>
    %cst_72 = arith.constant dense<0.000000e+00> : vector<10x32xf32>
    %119 = tpu.matmul %116, %118, %cst_72 {dimension_numbers = #tpu.dot_dimension_numbers<[1], [0], [0], [1], [0, 0, 1, 1], [], []>} : vector<10x16xf32>, vector<16x32xf32>, vector<10x32xf32> -> vector<10x32xf32>
    %120 = vector.extract_strided_slice %70 {offsets = [1, 0, 0], sizes = [1, 32, 16], strides = [1, 1, 1]} : vector<2x32x16xf32> to vector<1x32x16xf32>
    %121 = vector.shape_cast %120 : vector<1x32x16xf32> to vector<32x16xf32>
    %cst_73 = arith.constant dense<0.000000e+00> : vector<10x16xf32>
    %122 = tpu.matmul %68, %121, %cst_73 {dimension_numbers = #tpu.dot_dimension_numbers<[1], [0], [0], [1], [0, 0, 1, 1], [], []>} : vector<10x32xf32>, vector<32x16xf32>, vector<10x16xf32> -> vector<10x16xf32>
    %123 = vector.extract_strided_slice %76 {offsets = [1, 0, 0], sizes = [1, 1, 16], strides = [1, 1, 1]} : vector<2x1x16xf32> to vector<1x1x16xf32>
    %124 = vector.shape_cast %123 : vector<1x1x16xf32> to vector<1x16xf32>
    %125 = vector.broadcast %124 : vector<1x16xf32> to vector<10x16xf32>
    %126 = arith.addf %122, %125 : vector<10x16xf32>
    %127 = vector.extract_strided_slice %72 {offsets = [1, 0, 0], sizes = [1, 32, 16], strides = [1, 1, 1]} : vector<2x32x16xf32> to vector<1x32x16xf32>
    %128 = vector.shape_cast %127 : vector<1x32x16xf32> to vector<32x16xf32>
    %cst_74 = arith.constant dense<0.000000e+00> : vector<10x16xf32>
    %129 = tpu.matmul %68, %128, %cst_74 {dimension_numbers = #tpu.dot_dimension_numbers<[1], [0], [0], [1], [0, 0, 1, 1], [], []>} : vector<10x32xf32>, vector<32x16xf32>, vector<10x16xf32> -> vector<10x16xf32>
    %130 = vector.extract_strided_slice %78 {offsets = [1, 0, 0], sizes = [1, 1, 16], strides = [1, 1, 1]} : vector<2x1x16xf32> to vector<1x1x16xf32>
    %131 = vector.shape_cast %130 : vector<1x1x16xf32> to vector<1x16xf32>
    %132 = vector.broadcast %131 : vector<1x16xf32> to vector<10x16xf32>
    %133 = arith.addf %129, %132 : vector<10x16xf32>
    %134 = vector.extract_strided_slice %74 {offsets = [1, 0, 0], sizes = [1, 32, 16], strides = [1, 1, 1]} : vector<2x32x16xf32> to vector<1x32x16xf32>
    %135 = vector.shape_cast %134 : vector<1x32x16xf32> to vector<32x16xf32>
    %cst_75 = arith.constant dense<0.000000e+00> : vector<10x16xf32>
    %136 = tpu.matmul %68, %135, %cst_75 {dimension_numbers = #tpu.dot_dimension_numbers<[1], [0], [0], [1], [0, 0, 1, 1], [], []>} : vector<10x32xf32>, vector<32x16xf32>, vector<10x16xf32> -> vector<10x16xf32>
    %137 = vector.extract_strided_slice %80 {offsets = [1, 0, 0], sizes = [1, 1, 16], strides = [1, 1, 1]} : vector<2x1x16xf32> to vector<1x1x16xf32>
    %138 = vector.shape_cast %137 : vector<1x1x16xf32> to vector<1x16xf32>
    %139 = vector.broadcast %138 : vector<1x16xf32> to vector<10x16xf32>
    %140 = arith.addf %136, %139 : vector<10x16xf32>
    %cst_76 = arith.constant dense<0.000000e+00> : vector<10x10xf32>
    %141 = tpu.matmul %126, %133, %cst_76 {dimension_numbers = #tpu.dot_dimension_numbers<[1], [1], [0], [0], [0, 0, 1, 0], [], []>} : vector<10x16xf32>, vector<10x16xf32>, vector<10x10xf32> -> vector<10x10xf32>
    %142 = arith.addf %141, %40 : vector<10x10xf32>
    %cst_77 = arith.constant dense<0xFF800000> : vector<10xf32>
    %143 = vector.multi_reduction <maximumf>, %142, %cst_77 [1] : vector<10x10xf32> to vector<10xf32>
    %144 = vector.shape_cast %143 : vector<10xf32> to vector<10x1xf32>
    %145 = vector.broadcast %144 : vector<10x1xf32> to vector<10x10xf32>
    %146 = arith.subf %142, %145 : vector<10x10xf32>
    %147 = math.exp %146 : vector<10x10xf32>
    %cst_78 = arith.constant dense<0.000000e+00> : vector<10xf32>
    %148 = vector.multi_reduction <add>, %147, %cst_78 [1] : vector<10x10xf32> to vector<10xf32>
    %149 = vector.shape_cast %148 : vector<10xf32> to vector<10x1xf32>
    %150 = tpu.reciprocal %149 {approx = true} : vector<10x1xf32> -> vector<10x1xf32>
    %151 = vector.broadcast %150 : vector<10x1xf32> to vector<10x10xf32>
    %152 = arith.mulf %147, %151 : vector<10x10xf32>
    %cst_79 = arith.constant dense<0.000000e+00> : vector<10x16xf32>
    %153 = tpu.matmul %152, %140, %cst_79 {dimension_numbers = #tpu.dot_dimension_numbers<[1], [0], [0], [1], [0, 0, 1, 1], [], []>} : vector<10x10xf32>, vector<10x16xf32>, vector<10x16xf32> -> vector<10x16xf32>
    %154 = vector.extract_strided_slice %82 {offsets = [1, 0, 0], sizes = [1, 16, 32], strides = [1, 1, 1]} : vector<2x16x32xf32> to vector<1x16x32xf32>
    %155 = vector.shape_cast %154 : vector<1x16x32xf32> to vector<16x32xf32>
    %cst_80 = arith.constant dense<0.000000e+00> : vector<10x32xf32>
    %156 = tpu.matmul %153, %155, %cst_80 {dimension_numbers = #tpu.dot_dimension_numbers<[1], [0], [0], [1], [0, 0, 1, 1], [], []>} : vector<10x16xf32>, vector<16x32xf32>, vector<10x32xf32> -> vector<10x32xf32>
    %157 = arith.addf %119, %156 : vector<10x32xf32>
    %158 = arith.addf %39, %157 : vector<10x32xf32>
    %c0_81 = arith.constant 0 : index
    %c0_82 = arith.constant 0 : index
    %c0_83 = arith.constant 0 : index
    %159 = vector.load %arg15[%c0_81, %c0_82, %c0_83] : memref<2x1x32xf32, #tpu.memory_space<vmem>>, vector<1x1x32xf32>
    %160 = vector.shape_cast %159 : vector<1x1x32xf32> to vector<1x32xf32>
    %161 = vector.broadcast %160 : vector<1x32xf32> to vector<10x32xf32>
    %162 = arith.addf %158, %161 : vector<10x32xf32>
    %c0_84 = arith.constant 0 : index
    %c0_85 = arith.constant 0 : index
    %c0_86 = arith.constant 0 : index
    %163 = vector.load %arg16[%c0_84, %c0_85, %c0_86] : memref<2x1x32xf32, #tpu.memory_space<vmem>>, vector<1x1x32xf32>
    %164 = vector.shape_cast %163 : vector<1x1x32xf32> to vector<1x32xf32>
    %c0_87 = arith.constant 0 : index
    %c0_88 = arith.constant 0 : index
    %c0_89 = arith.constant 0 : index
    %165 = vector.load %arg17[%c0_87, %c0_88, %c0_89] : memref<2x1x32xf32, #tpu.memory_space<vmem>>, vector<1x1x32xf32>
    %166 = vector.shape_cast %165 : vector<1x1x32xf32> to vector<1x32xf32>
    %cst_90 = arith.constant dense<0.000000e+00> : vector<10xf32>
    %167 = vector.multi_reduction <add>, %162, %cst_90 [1] : vector<10x32xf32> to vector<10xf32>
    %168 = vector.shape_cast %167 : vector<10xf32> to vector<10x1xf32>
    %cst_91 = arith.constant 3.200000e+01 : f32
    %169 = vector.broadcast %cst_91 : f32 to vector<10x1xf32>
    %170 = arith.divf %168, %169 : vector<10x1xf32>
    %171 = vector.broadcast %170 : vector<10x1xf32> to vector<10x32xf32>
    %172 = arith.subf %162, %171 : vector<10x32xf32>
    %173 = vector.broadcast %170 : vector<10x1xf32> to vector<10x32xf32>
    %174 = arith.subf %162, %173 : vector<10x32xf32>
    %175 = arith.mulf %172, %174 : vector<10x32xf32>
    %cst_92 = arith.constant dense<0.000000e+00> : vector<10xf32>
    %176 = vector.multi_reduction <add>, %175, %cst_92 [1] : vector<10x32xf32> to vector<10xf32>
    %177 = vector.shape_cast %176 : vector<10xf32> to vector<10x1xf32>
    %cst_93 = arith.constant 3.200000e+01 : f32
    %178 = vector.broadcast %cst_93 : f32 to vector<10x1xf32>
    %179 = arith.divf %177, %178 : vector<10x1xf32>
    %180 = vector.broadcast %170 : vector<10x1xf32> to vector<10x32xf32>
    %181 = arith.subf %162, %180 : vector<10x32xf32>
    %cst_94 = arith.constant 9.99999974E-6 : f32
    %182 = vector.broadcast %cst_94 : f32 to vector<10x1xf32>
    %183 = arith.addf %179, %182 : vector<10x1xf32>
    %184 = math.rsqrt %183 : vector<10x1xf32>
    %185 = vector.broadcast %184 : vector<10x1xf32> to vector<10x32xf32>
    %186 = arith.mulf %181, %185 : vector<10x32xf32>
    %187 = vector.broadcast %164 : vector<1x32xf32> to vector<10x32xf32>
    %188 = arith.mulf %186, %187 : vector<10x32xf32>
    %189 = vector.broadcast %166 : vector<1x32xf32> to vector<10x32xf32>
    %190 = arith.addf %188, %189 : vector<10x32xf32>
    %c0_95 = arith.constant 0 : index
    %c0_96 = arith.constant 0 : index
    %c0_97 = arith.constant 0 : index
    %191 = vector.load %arg18[%c0_95, %c0_96, %c0_97] : memref<2x32x128xf32, #tpu.memory_space<vmem>>, vector<1x32x128xf32>
    %192 = vector.shape_cast %191 : vector<1x32x128xf32> to vector<32x128xf32>
    %cst_98 = arith.constant dense<0.000000e+00> : vector<10x128xf32>
    %193 = tpu.matmul %190, %192, %cst_98 {dimension_numbers = #tpu.dot_dimension_numbers<[1], [0], [0], [1], [0, 0, 1, 1], [], []>} : vector<10x32xf32>, vector<32x128xf32>, vector<10x128xf32> -> vector<10x128xf32>
    %c0_99 = arith.constant 0 : index
    %c0_100 = arith.constant 0 : index
    %c0_101 = arith.constant 0 : index
    %194 = vector.load %arg19[%c0_99, %c0_100, %c0_101] : memref<2x1x128xf32, #tpu.memory_space<vmem>>, vector<1x1x128xf32>
    %195 = vector.shape_cast %194 : vector<1x1x128xf32> to vector<1x128xf32>
    %196 = vector.broadcast %195 : vector<1x128xf32> to vector<10x128xf32>
    %197 = arith.addf %193, %196 : vector<10x128xf32>
    %cst_102 = arith.constant 1.702000e+00 : f32
    %198 = vector.broadcast %cst_102 : f32 to vector<10x128xf32>
    %199 = arith.mulf %198, %197 : vector<10x128xf32>
    %200 = arith.negf %199 : vector<10x128xf32>
    %201 = math.exp %200 : vector<10x128xf32>
    %cst_103 = arith.constant 1.000000e+00 : f32
    %202 = vector.broadcast %cst_103 : f32 to vector<10x128xf32>
    %203 = arith.addf %202, %201 : vector<10x128xf32>
    %204 = arith.divf %202, %203 : vector<10x128xf32>
    %205 = arith.mulf %197, %204 : vector<10x128xf32>
    %c0_104 = arith.constant 0 : index
    %c0_105 = arith.constant 0 : index
    %c0_106 = arith.constant 0 : index
    %206 = vector.load %arg20[%c0_104, %c0_105, %c0_106] : memref<2x128x32xf32, #tpu.memory_space<vmem>>, vector<1x128x32xf32>
    %207 = vector.shape_cast %206 : vector<1x128x32xf32> to vector<128x32xf32>
    %cst_107 = arith.constant dense<0.000000e+00> : vector<10x32xf32>
    %208 = tpu.matmul %205, %207, %cst_107 {dimension_numbers = #tpu.dot_dimension_numbers<[1], [0], [0], [1], [0, 0, 1, 1], [], []>} : vector<10x128xf32>, vector<128x32xf32>, vector<10x32xf32> -> vector<10x32xf32>
    %209 = arith.addf %162, %208 : vector<10x32xf32>
    %c0_108 = arith.constant 0 : index
    %c0_109 = arith.constant 0 : index
    %c0_110 = arith.constant 0 : index
    %210 = vector.load %arg21[%c0_108, %c0_109, %c0_110] : memref<2x1x32xf32, #tpu.memory_space<vmem>>, vector<1x1x32xf32>
    %211 = vector.shape_cast %210 : vector<1x1x32xf32> to vector<1x32xf32>
    %212 = vector.broadcast %211 : vector<1x32xf32> to vector<10x32xf32>
    %213 = arith.addf %209, %212 : vector<10x32xf32>
    %c1_111 = arith.constant 1 : index
    %c0_112 = arith.constant 0 : index
    %c0_113 = arith.constant 0 : index
    %214 = vector.load %arg6[%c1_111, %c0_112, %c0_113] : memref<2x1x32xf32, #tpu.memory_space<vmem>>, vector<1x1x32xf32>
    %215 = vector.shape_cast %214 : vector<1x1x32xf32> to vector<1x32xf32>
    %c1_114 = arith.constant 1 : index
    %c0_115 = arith.constant 0 : index
    %c0_116 = arith.constant 0 : index
    %216 = vector.load %arg7[%c1_114, %c0_115, %c0_116] : memref<2x1x32xf32, #tpu.memory_space<vmem>>, vector<1x1x32xf32>
    %217 = vector.shape_cast %216 : vector<1x1x32xf32> to vector<1x32xf32>
    %cst_117 = arith.constant dense<0.000000e+00> : vector<10xf32>
    %218 = vector.multi_reduction <add>, %213, %cst_117 [1] : vector<10x32xf32> to vector<10xf32>
    %219 = vector.shape_cast %218 : vector<10xf32> to vector<10x1xf32>
    %cst_118 = arith.constant 3.200000e+01 : f32
    %220 = vector.broadcast %cst_118 : f32 to vector<10x1xf32>
    %221 = arith.divf %219, %220 : vector<10x1xf32>
    %222 = vector.broadcast %221 : vector<10x1xf32> to vector<10x32xf32>
    %223 = arith.subf %213, %222 : vector<10x32xf32>
    %224 = vector.broadcast %221 : vector<10x1xf32> to vector<10x32xf32>
    %225 = arith.subf %213, %224 : vector<10x32xf32>
    %226 = arith.mulf %223, %225 : vector<10x32xf32>
    %cst_119 = arith.constant dense<0.000000e+00> : vector<10xf32>
    %227 = vector.multi_reduction <add>, %226, %cst_119 [1] : vector<10x32xf32> to vector<10xf32>
    %228 = vector.shape_cast %227 : vector<10xf32> to vector<10x1xf32>
    %cst_120 = arith.constant 3.200000e+01 : f32
    %229 = vector.broadcast %cst_120 : f32 to vector<10x1xf32>
    %230 = arith.divf %228, %229 : vector<10x1xf32>
    %231 = vector.broadcast %221 : vector<10x1xf32> to vector<10x32xf32>
    %232 = arith.subf %213, %231 : vector<10x32xf32>
    %cst_121 = arith.constant 9.99999974E-6 : f32
    %233 = vector.broadcast %cst_121 : f32 to vector<10x1xf32>
    %234 = arith.addf %230, %233 : vector<10x1xf32>
    %235 = math.rsqrt %234 : vector<10x1xf32>
    %236 = vector.broadcast %235 : vector<10x1xf32> to vector<10x32xf32>
    %237 = arith.mulf %232, %236 : vector<10x32xf32>
    %238 = vector.broadcast %215 : vector<1x32xf32> to vector<10x32xf32>
    %239 = arith.mulf %237, %238 : vector<10x32xf32>
    %240 = vector.broadcast %217 : vector<1x32xf32> to vector<10x32xf32>
    %241 = arith.addf %239, %240 : vector<10x32xf32>
    %c1_122 = arith.constant 1 : index
    %c0_123 = arith.constant 0 : index
    %c0_124 = arith.constant 0 : index
    %c0_125 = arith.constant 0 : index
    %242 = vector.load %arg8[%c1_122, %c0_123, %c0_124, %c0_125] : memref<2x2x32x16xf32, #tpu.memory_space<vmem>>, vector<1x2x32x16xf32>
    %243 = vector.shape_cast %242 : vector<1x2x32x16xf32> to vector<2x32x16xf32>
    %c1_126 = arith.constant 1 : index
    %c0_127 = arith.constant 0 : index
    %c0_128 = arith.constant 0 : index
    %c0_129 = arith.constant 0 : index
    %244 = vector.load %arg9[%c1_126, %c0_127, %c0_128, %c0_129] : memref<2x2x32x16xf32, #tpu.memory_space<vmem>>, vector<1x2x32x16xf32>
    %245 = vector.shape_cast %244 : vector<1x2x32x16xf32> to vector<2x32x16xf32>
    %c1_130 = arith.constant 1 : index
    %c0_131 = arith.constant 0 : index
    %c0_132 = arith.constant 0 : index
    %c0_133 = arith.constant 0 : index
    %246 = vector.load %arg10[%c1_130, %c0_131, %c0_132, %c0_133] : memref<2x2x32x16xf32, #tpu.memory_space<vmem>>, vector<1x2x32x16xf32>
    %247 = vector.shape_cast %246 : vector<1x2x32x16xf32> to vector<2x32x16xf32>
    %c1_134 = arith.constant 1 : index
    %c0_135 = arith.constant 0 : index
    %c0_136 = arith.constant 0 : index
    %c0_137 = arith.constant 0 : index
    %248 = vector.load %arg11[%c1_134, %c0_135, %c0_136, %c0_137] : memref<2x2x1x16xf32, #tpu.memory_space<vmem>>, vector<1x2x1x16xf32>
    %249 = vector.shape_cast %248 : vector<1x2x1x16xf32> to vector<2x1x16xf32>
    %c1_138 = arith.constant 1 : index
    %c0_139 = arith.constant 0 : index
    %c0_140 = arith.constant 0 : index
    %c0_141 = arith.constant 0 : index
    %250 = vector.load %arg12[%c1_138, %c0_139, %c0_140, %c0_141] : memref<2x2x1x16xf32, #tpu.memory_space<vmem>>, vector<1x2x1x16xf32>
    %251 = vector.shape_cast %250 : vector<1x2x1x16xf32> to vector<2x1x16xf32>
    %c1_142 = arith.constant 1 : index
    %c0_143 = arith.constant 0 : index
    %c0_144 = arith.constant 0 : index
    %c0_145 = arith.constant 0 : index
    %252 = vector.load %arg13[%c1_142, %c0_143, %c0_144, %c0_145] : memref<2x2x1x16xf32, #tpu.memory_space<vmem>>, vector<1x2x1x16xf32>
    %253 = vector.shape_cast %252 : vector<1x2x1x16xf32> to vector<2x1x16xf32>
    %c1_146 = arith.constant 1 : index
    %c0_147 = arith.constant 0 : index
    %c0_148 = arith.constant 0 : index
    %c0_149 = arith.constant 0 : index
    %254 = vector.load %arg14[%c1_146, %c0_147, %c0_148, %c0_149] : memref<2x2x16x32xf32, #tpu.memory_space<vmem>>, vector<1x2x16x32xf32>
    %255 = vector.shape_cast %254 : vector<1x2x16x32xf32> to vector<2x16x32xf32>
    %256 = vector.extract_strided_slice %243 {offsets = [0, 0, 0], sizes = [1, 32, 16], strides = [1, 1, 1]} : vector<2x32x16xf32> to vector<1x32x16xf32>
    %257 = vector.shape_cast %256 : vector<1x32x16xf32> to vector<32x16xf32>
    %cst_150 = arith.constant dense<0.000000e+00> : vector<10x16xf32>
    %258 = tpu.matmul %241, %257, %cst_150 {dimension_numbers = #tpu.dot_dimension_numbers<[1], [0], [0], [1], [0, 0, 1, 1], [], []>} : vector<10x32xf32>, vector<32x16xf32>, vector<10x16xf32> -> vector<10x16xf32>
    %259 = vector.extract_strided_slice %249 {offsets = [0, 0, 0], sizes = [1, 1, 16], strides = [1, 1, 1]} : vector<2x1x16xf32> to vector<1x1x16xf32>
    %260 = vector.shape_cast %259 : vector<1x1x16xf32> to vector<1x16xf32>
    %261 = vector.broadcast %260 : vector<1x16xf32> to vector<10x16xf32>
    %262 = arith.addf %258, %261 : vector<10x16xf32>
    %263 = vector.extract_strided_slice %245 {offsets = [0, 0, 0], sizes = [1, 32, 16], strides = [1, 1, 1]} : vector<2x32x16xf32> to vector<1x32x16xf32>
    %264 = vector.shape_cast %263 : vector<1x32x16xf32> to vector<32x16xf32>
    %cst_151 = arith.constant dense<0.000000e+00> : vector<10x16xf32>
    %265 = tpu.matmul %241, %264, %cst_151 {dimension_numbers = #tpu.dot_dimension_numbers<[1], [0], [0], [1], [0, 0, 1, 1], [], []>} : vector<10x32xf32>, vector<32x16xf32>, vector<10x16xf32> -> vector<10x16xf32>
    %266 = vector.extract_strided_slice %251 {offsets = [0, 0, 0], sizes = [1, 1, 16], strides = [1, 1, 1]} : vector<2x1x16xf32> to vector<1x1x16xf32>
    %267 = vector.shape_cast %266 : vector<1x1x16xf32> to vector<1x16xf32>
    %268 = vector.broadcast %267 : vector<1x16xf32> to vector<10x16xf32>
    %269 = arith.addf %265, %268 : vector<10x16xf32>
    %270 = vector.extract_strided_slice %247 {offsets = [0, 0, 0], sizes = [1, 32, 16], strides = [1, 1, 1]} : vector<2x32x16xf32> to vector<1x32x16xf32>
    %271 = vector.shape_cast %270 : vector<1x32x16xf32> to vector<32x16xf32>
    %cst_152 = arith.constant dense<0.000000e+00> : vector<10x16xf32>
    %272 = tpu.matmul %241, %271, %cst_152 {dimension_numbers = #tpu.dot_dimension_numbers<[1], [0], [0], [1], [0, 0, 1, 1], [], []>} : vector<10x32xf32>, vector<32x16xf32>, vector<10x16xf32> -> vector<10x16xf32>
    %273 = vector.extract_strided_slice %253 {offsets = [0, 0, 0], sizes = [1, 1, 16], strides = [1, 1, 1]} : vector<2x1x16xf32> to vector<1x1x16xf32>
    %274 = vector.shape_cast %273 : vector<1x1x16xf32> to vector<1x16xf32>
    %275 = vector.broadcast %274 : vector<1x16xf32> to vector<10x16xf32>
    %276 = arith.addf %272, %275 : vector<10x16xf32>
    %cst_153 = arith.constant dense<0.000000e+00> : vector<10x10xf32>
    %277 = tpu.matmul %262, %269, %cst_153 {dimension_numbers = #tpu.dot_dimension_numbers<[1], [1], [0], [0], [0, 0, 1, 0], [], []>} : vector<10x16xf32>, vector<10x16xf32>, vector<10x10xf32> -> vector<10x10xf32>
    %278 = arith.addf %277, %40 : vector<10x10xf32>
    %cst_154 = arith.constant dense<0xFF800000> : vector<10xf32>
    %279 = vector.multi_reduction <maximumf>, %278, %cst_154 [1] : vector<10x10xf32> to vector<10xf32>
    %280 = vector.shape_cast %279 : vector<10xf32> to vector<10x1xf32>
    %281 = vector.broadcast %280 : vector<10x1xf32> to vector<10x10xf32>
    %282 = arith.subf %278, %281 : vector<10x10xf32>
    %283 = math.exp %282 : vector<10x10xf32>
    %cst_155 = arith.constant dense<0.000000e+00> : vector<10xf32>
    %284 = vector.multi_reduction <add>, %283, %cst_155 [1] : vector<10x10xf32> to vector<10xf32>
    %285 = vector.shape_cast %284 : vector<10xf32> to vector<10x1xf32>
    %286 = tpu.reciprocal %285 {approx = true} : vector<10x1xf32> -> vector<10x1xf32>
    %287 = vector.broadcast %286 : vector<10x1xf32> to vector<10x10xf32>
    %288 = arith.mulf %283, %287 : vector<10x10xf32>
    %cst_156 = arith.constant dense<0.000000e+00> : vector<10x16xf32>
    %289 = tpu.matmul %288, %276, %cst_156 {dimension_numbers = #tpu.dot_dimension_numbers<[1], [0], [0], [1], [0, 0, 1, 1], [], []>} : vector<10x10xf32>, vector<10x16xf32>, vector<10x16xf32> -> vector<10x16xf32>
    %290 = vector.extract_strided_slice %255 {offsets = [0, 0, 0], sizes = [1, 16, 32], strides = [1, 1, 1]} : vector<2x16x32xf32> to vector<1x16x32xf32>
    %291 = vector.shape_cast %290 : vector<1x16x32xf32> to vector<16x32xf32>
    %cst_157 = arith.constant dense<0.000000e+00> : vector<10x32xf32>
    %292 = tpu.matmul %289, %291, %cst_157 {dimension_numbers = #tpu.dot_dimension_numbers<[1], [0], [0], [1], [0, 0, 1, 1], [], []>} : vector<10x16xf32>, vector<16x32xf32>, vector<10x32xf32> -> vector<10x32xf32>
    %293 = vector.extract_strided_slice %243 {offsets = [1, 0, 0], sizes = [1, 32, 16], strides = [1, 1, 1]} : vector<2x32x16xf32> to vector<1x32x16xf32>
    %294 = vector.shape_cast %293 : vector<1x32x16xf32> to vector<32x16xf32>
    %cst_158 = arith.constant dense<0.000000e+00> : vector<10x16xf32>
    %295 = tpu.matmul %241, %294, %cst_158 {dimension_numbers = #tpu.dot_dimension_numbers<[1], [0], [0], [1], [0, 0, 1, 1], [], []>} : vector<10x32xf32>, vector<32x16xf32>, vector<10x16xf32> -> vector<10x16xf32>
    %296 = vector.extract_strided_slice %249 {offsets = [1, 0, 0], sizes = [1, 1, 16], strides = [1, 1, 1]} : vector<2x1x16xf32> to vector<1x1x16xf32>
    %297 = vector.shape_cast %296 : vector<1x1x16xf32> to vector<1x16xf32>
    %298 = vector.broadcast %297 : vector<1x16xf32> to vector<10x16xf32>
    %299 = arith.addf %295, %298 : vector<10x16xf32>
    %300 = vector.extract_strided_slice %245 {offsets = [1, 0, 0], sizes = [1, 32, 16], strides = [1, 1, 1]} : vector<2x32x16xf32> to vector<1x32x16xf32>
    %301 = vector.shape_cast %300 : vector<1x32x16xf32> to vector<32x16xf32>
    %cst_159 = arith.constant dense<0.000000e+00> : vector<10x16xf32>
    %302 = tpu.matmul %241, %301, %cst_159 {dimension_numbers = #tpu.dot_dimension_numbers<[1], [0], [0], [1], [0, 0, 1, 1], [], []>} : vector<10x32xf32>, vector<32x16xf32>, vector<10x16xf32> -> vector<10x16xf32>
    %303 = vector.extract_strided_slice %251 {offsets = [1, 0, 0], sizes = [1, 1, 16], strides = [1, 1, 1]} : vector<2x1x16xf32> to vector<1x1x16xf32>
    %304 = vector.shape_cast %303 : vector<1x1x16xf32> to vector<1x16xf32>
    %305 = vector.broadcast %304 : vector<1x16xf32> to vector<10x16xf32>
    %306 = arith.addf %302, %305 : vector<10x16xf32>
    %307 = vector.extract_strided_slice %247 {offsets = [1, 0, 0], sizes = [1, 32, 16], strides = [1, 1, 1]} : vector<2x32x16xf32> to vector<1x32x16xf32>
    %308 = vector.shape_cast %307 : vector<1x32x16xf32> to vector<32x16xf32>
    %cst_160 = arith.constant dense<0.000000e+00> : vector<10x16xf32>
    %309 = tpu.matmul %241, %308, %cst_160 {dimension_numbers = #tpu.dot_dimension_numbers<[1], [0], [0], [1], [0, 0, 1, 1], [], []>} : vector<10x32xf32>, vector<32x16xf32>, vector<10x16xf32> -> vector<10x16xf32>
    %310 = vector.extract_strided_slice %253 {offsets = [1, 0, 0], sizes = [1, 1, 16], strides = [1, 1, 1]} : vector<2x1x16xf32> to vector<1x1x16xf32>
    %311 = vector.shape_cast %310 : vector<1x1x16xf32> to vector<1x16xf32>
    %312 = vector.broadcast %311 : vector<1x16xf32> to vector<10x16xf32>
    %313 = arith.addf %309, %312 : vector<10x16xf32>
    %cst_161 = arith.constant dense<0.000000e+00> : vector<10x10xf32>
    %314 = tpu.matmul %299, %306, %cst_161 {dimension_numbers = #tpu.dot_dimension_numbers<[1], [1], [0], [0], [0, 0, 1, 0], [], []>} : vector<10x16xf32>, vector<10x16xf32>, vector<10x10xf32> -> vector<10x10xf32>
    %315 = arith.addf %314, %40 : vector<10x10xf32>
    %cst_162 = arith.constant dense<0xFF800000> : vector<10xf32>
    %316 = vector.multi_reduction <maximumf>, %315, %cst_162 [1] : vector<10x10xf32> to vector<10xf32>
    %317 = vector.shape_cast %316 : vector<10xf32> to vector<10x1xf32>
    %318 = vector.broadcast %317 : vector<10x1xf32> to vector<10x10xf32>
    %319 = arith.subf %315, %318 : vector<10x10xf32>
    %320 = math.exp %319 : vector<10x10xf32>
    %cst_163 = arith.constant dense<0.000000e+00> : vector<10xf32>
    %321 = vector.multi_reduction <add>, %320, %cst_163 [1] : vector<10x10xf32> to vector<10xf32>
    %322 = vector.shape_cast %321 : vector<10xf32> to vector<10x1xf32>
    %323 = tpu.reciprocal %322 {approx = true} : vector<10x1xf32> -> vector<10x1xf32>
    %324 = vector.broadcast %323 : vector<10x1xf32> to vector<10x10xf32>
    %325 = arith.mulf %320, %324 : vector<10x10xf32>
    %cst_164 = arith.constant dense<0.000000e+00> : vector<10x16xf32>
    %326 = tpu.matmul %325, %313, %cst_164 {dimension_numbers = #tpu.dot_dimension_numbers<[1], [0], [0], [1], [0, 0, 1, 1], [], []>} : vector<10x10xf32>, vector<10x16xf32>, vector<10x16xf32> -> vector<10x16xf32>
    %327 = vector.extract_strided_slice %255 {offsets = [1, 0, 0], sizes = [1, 16, 32], strides = [1, 1, 1]} : vector<2x16x32xf32> to vector<1x16x32xf32>
    %328 = vector.shape_cast %327 : vector<1x16x32xf32> to vector<16x32xf32>
    %cst_165 = arith.constant dense<0.000000e+00> : vector<10x32xf32>
    %329 = tpu.matmul %326, %328, %cst_165 {dimension_numbers = #tpu.dot_dimension_numbers<[1], [0], [0], [1], [0, 0, 1, 1], [], []>} : vector<10x16xf32>, vector<16x32xf32>, vector<10x32xf32> -> vector<10x32xf32>
    %330 = arith.addf %292, %329 : vector<10x32xf32>
    %331 = arith.addf %213, %330 : vector<10x32xf32>
    %c1_166 = arith.constant 1 : index
    %c0_167 = arith.constant 0 : index
    %c0_168 = arith.constant 0 : index
    %332 = vector.load %arg15[%c1_166, %c0_167, %c0_168] : memref<2x1x32xf32, #tpu.memory_space<vmem>>, vector<1x1x32xf32>
    %333 = vector.shape_cast %332 : vector<1x1x32xf32> to vector<1x32xf32>
    %334 = vector.broadcast %333 : vector<1x32xf32> to vector<10x32xf32>
    %335 = arith.addf %331, %334 : vector<10x32xf32>
    %c1_169 = arith.constant 1 : index
    %c0_170 = arith.constant 0 : index
    %c0_171 = arith.constant 0 : index
    %336 = vector.load %arg16[%c1_169, %c0_170, %c0_171] : memref<2x1x32xf32, #tpu.memory_space<vmem>>, vector<1x1x32xf32>
    %337 = vector.shape_cast %336 : vector<1x1x32xf32> to vector<1x32xf32>
    %c1_172 = arith.constant 1 : index
    %c0_173 = arith.constant 0 : index
    %c0_174 = arith.constant 0 : index
    %338 = vector.load %arg17[%c1_172, %c0_173, %c0_174] : memref<2x1x32xf32, #tpu.memory_space<vmem>>, vector<1x1x32xf32>
    %339 = vector.shape_cast %338 : vector<1x1x32xf32> to vector<1x32xf32>
    %cst_175 = arith.constant dense<0.000000e+00> : vector<10xf32>
    %340 = vector.multi_reduction <add>, %335, %cst_175 [1] : vector<10x32xf32> to vector<10xf32>
    %341 = vector.shape_cast %340 : vector<10xf32> to vector<10x1xf32>
    %cst_176 = arith.constant 3.200000e+01 : f32
    %342 = vector.broadcast %cst_176 : f32 to vector<10x1xf32>
    %343 = arith.divf %341, %342 : vector<10x1xf32>
    %344 = vector.broadcast %343 : vector<10x1xf32> to vector<10x32xf32>
    %345 = arith.subf %335, %344 : vector<10x32xf32>
    %346 = vector.broadcast %343 : vector<10x1xf32> to vector<10x32xf32>
    %347 = arith.subf %335, %346 : vector<10x32xf32>
    %348 = arith.mulf %345, %347 : vector<10x32xf32>
    %cst_177 = arith.constant dense<0.000000e+00> : vector<10xf32>
    %349 = vector.multi_reduction <add>, %348, %cst_177 [1] : vector<10x32xf32> to vector<10xf32>
    %350 = vector.shape_cast %349 : vector<10xf32> to vector<10x1xf32>
    %cst_178 = arith.constant 3.200000e+01 : f32
    %351 = vector.broadcast %cst_178 : f32 to vector<10x1xf32>
    %352 = arith.divf %350, %351 : vector<10x1xf32>
    %353 = vector.broadcast %343 : vector<10x1xf32> to vector<10x32xf32>
    %354 = arith.subf %335, %353 : vector<10x32xf32>
    %cst_179 = arith.constant 9.99999974E-6 : f32
    %355 = vector.broadcast %cst_179 : f32 to vector<10x1xf32>
    %356 = arith.addf %352, %355 : vector<10x1xf32>
    %357 = math.rsqrt %356 : vector<10x1xf32>
    %358 = vector.broadcast %357 : vector<10x1xf32> to vector<10x32xf32>
    %359 = arith.mulf %354, %358 : vector<10x32xf32>
    %360 = vector.broadcast %337 : vector<1x32xf32> to vector<10x32xf32>
    %361 = arith.mulf %359, %360 : vector<10x32xf32>
    %362 = vector.broadcast %339 : vector<1x32xf32> to vector<10x32xf32>
    %363 = arith.addf %361, %362 : vector<10x32xf32>
    %c1_180 = arith.constant 1 : index
    %c0_181 = arith.constant 0 : index
    %c0_182 = arith.constant 0 : index
    %364 = vector.load %arg18[%c1_180, %c0_181, %c0_182] : memref<2x32x128xf32, #tpu.memory_space<vmem>>, vector<1x32x128xf32>
    %365 = vector.shape_cast %364 : vector<1x32x128xf32> to vector<32x128xf32>
    %cst_183 = arith.constant dense<0.000000e+00> : vector<10x128xf32>
    %366 = tpu.matmul %363, %365, %cst_183 {dimension_numbers = #tpu.dot_dimension_numbers<[1], [0], [0], [1], [0, 0, 1, 1], [], []>} : vector<10x32xf32>, vector<32x128xf32>, vector<10x128xf32> -> vector<10x128xf32>
    %c1_184 = arith.constant 1 : index
    %c0_185 = arith.constant 0 : index
    %c0_186 = arith.constant 0 : index
    %367 = vector.load %arg19[%c1_184, %c0_185, %c0_186] : memref<2x1x128xf32, #tpu.memory_space<vmem>>, vector<1x1x128xf32>
    %368 = vector.shape_cast %367 : vector<1x1x128xf32> to vector<1x128xf32>
    %369 = vector.broadcast %368 : vector<1x128xf32> to vector<10x128xf32>
    %370 = arith.addf %366, %369 : vector<10x128xf32>
    %cst_187 = arith.constant 1.702000e+00 : f32
    %371 = vector.broadcast %cst_187 : f32 to vector<10x128xf32>
    %372 = arith.mulf %371, %370 : vector<10x128xf32>
    %373 = arith.negf %372 : vector<10x128xf32>
    %374 = math.exp %373 : vector<10x128xf32>
    %cst_188 = arith.constant 1.000000e+00 : f32
    %375 = vector.broadcast %cst_188 : f32 to vector<10x128xf32>
    %376 = arith.addf %375, %374 : vector<10x128xf32>
    %377 = arith.divf %375, %376 : vector<10x128xf32>
    %378 = arith.mulf %370, %377 : vector<10x128xf32>
    %c1_189 = arith.constant 1 : index
    %c0_190 = arith.constant 0 : index
    %c0_191 = arith.constant 0 : index
    %379 = vector.load %arg20[%c1_189, %c0_190, %c0_191] : memref<2x128x32xf32, #tpu.memory_space<vmem>>, vector<1x128x32xf32>
    %380 = vector.shape_cast %379 : vector<1x128x32xf32> to vector<128x32xf32>
    %cst_192 = arith.constant dense<0.000000e+00> : vector<10x32xf32>
    %381 = tpu.matmul %378, %380, %cst_192 {dimension_numbers = #tpu.dot_dimension_numbers<[1], [0], [0], [1], [0, 0, 1, 1], [], []>} : vector<10x128xf32>, vector<128x32xf32>, vector<10x32xf32> -> vector<10x32xf32>
    %382 = arith.addf %335, %381 : vector<10x32xf32>
    %c1_193 = arith.constant 1 : index
    %c0_194 = arith.constant 0 : index
    %c0_195 = arith.constant 0 : index
    %383 = vector.load %arg21[%c1_193, %c0_194, %c0_195] : memref<2x1x32xf32, #tpu.memory_space<vmem>>, vector<1x1x32xf32>
    %384 = vector.shape_cast %383 : vector<1x1x32xf32> to vector<1x32xf32>
    %385 = vector.broadcast %384 : vector<1x32xf32> to vector<10x32xf32>
    %386 = arith.addf %382, %385 : vector<10x32xf32>
    %387 = vector.extract_strided_slice %386 {offsets = [0, 0], sizes = [1, 32], strides = [1, 1]} : vector<10x32xf32> to vector<1x32xf32>
    %388 = vector.extract_strided_slice %386 {offsets = [5, 0], sizes = [1, 32], strides = [1, 1]} : vector<10x32xf32> to vector<1x32xf32>
    %389 = tpu.concatenate %387, %388 in 0 : vector<1x32xf32>, vector<1x32xf32> -> vector<2x32xf32>
    %c0_196 = arith.constant 0 : index
    %c0_197 = arith.constant 0 : index
    %390 = vector.load %arg22[%c0_196, %c0_197] : memref<1x32xf32, #tpu.memory_space<vmem>>, vector<1x32xf32>
    %c0_198 = arith.constant 0 : index
    %c0_199 = arith.constant 0 : index
    %391 = vector.load %arg23[%c0_198, %c0_199] : memref<1x32xf32, #tpu.memory_space<vmem>>, vector<1x32xf32>
    %cst_200 = arith.constant dense<0.000000e+00> : vector<2xf32>
    %392 = vector.multi_reduction <add>, %389, %cst_200 [1] : vector<2x32xf32> to vector<2xf32>
    %393 = vector.shape_cast %392 : vector<2xf32> to vector<2x1xf32>
    %cst_201 = arith.constant 3.200000e+01 : f32
    %394 = vector.broadcast %cst_201 : f32 to vector<2x1xf32>
    %395 = arith.divf %393, %394 : vector<2x1xf32>
    %396 = vector.broadcast %395 : vector<2x1xf32> to vector<2x32xf32>
    %397 = arith.subf %389, %396 : vector<2x32xf32>
    %398 = vector.broadcast %395 : vector<2x1xf32> to vector<2x32xf32>
    %399 = arith.subf %389, %398 : vector<2x32xf32>
    %400 = arith.mulf %397, %399 : vector<2x32xf32>
    %cst_202 = arith.constant dense<0.000000e+00> : vector<2xf32>
    %401 = vector.multi_reduction <add>, %400, %cst_202 [1] : vector<2x32xf32> to vector<2xf32>
    %402 = vector.shape_cast %401 : vector<2xf32> to vector<2x1xf32>
    %cst_203 = arith.constant 3.200000e+01 : f32
    %403 = vector.broadcast %cst_203 : f32 to vector<2x1xf32>
    %404 = arith.divf %402, %403 : vector<2x1xf32>
    %405 = vector.broadcast %395 : vector<2x1xf32> to vector<2x32xf32>
    %406 = arith.subf %389, %405 : vector<2x32xf32>
    %cst_204 = arith.constant 9.99999974E-6 : f32
    %407 = vector.broadcast %cst_204 : f32 to vector<2x1xf32>
    %408 = arith.addf %404, %407 : vector<2x1xf32>
    %409 = math.rsqrt %408 : vector<2x1xf32>
    %410 = vector.broadcast %409 : vector<2x1xf32> to vector<2x32xf32>
    %411 = arith.mulf %406, %410 : vector<2x32xf32>
    %412 = vector.broadcast %390 : vector<1x32xf32> to vector<2x32xf32>
    %413 = arith.mulf %411, %412 : vector<2x32xf32>
    %414 = vector.broadcast %391 : vector<1x32xf32> to vector<2x32xf32>
    %415 = arith.addf %413, %414 : vector<2x32xf32>
    %c0_205 = arith.constant 0 : index
    %c0_206 = arith.constant 0 : index
    %416 = vector.load %arg24[%c0_205, %c0_206] : memref<32x16xf32, #tpu.memory_space<vmem>>, vector<32x16xf32>
    %cst_207 = arith.constant dense<0.000000e+00> : vector<2x16xf32>
    %417 = tpu.matmul %415, %416, %cst_207 {dimension_numbers = #tpu.dot_dimension_numbers<[1], [0], [0], [1], [0, 0, 1, 1], [], []>} : vector<2x32xf32>, vector<32x16xf32>, vector<2x16xf32> -> vector<2x16xf32>
    %c0_208 = arith.constant 0 : index
    %c0_209 = arith.constant 0 : index
    %418 = vector.load %arg25[%c0_208, %c0_209] : memref<16x8xf32, #tpu.memory_space<vmem>>, vector<16x8xf32>
    %cst_210 = arith.constant dense<0.000000e+00> : vector<2x8xf32>
    %419 = tpu.matmul %417, %418, %cst_210 {dimension_numbers = #tpu.dot_dimension_numbers<[1], [0], [0], [1], [0, 0, 1, 1], [], []>} : vector<2x16xf32>, vector<16x8xf32>, vector<2x8xf32> -> vector<2x8xf32>
    %c0_211 = arith.constant 0 : index
    %c0_212 = arith.constant 0 : index
    %420 = vector.load %arg26[%c0_211, %c0_212] : memref<1x8xf32, #tpu.memory_space<vmem>>, vector<1x8xf32>
    %421 = vector.broadcast %420 : vector<1x8xf32> to vector<2x8xf32>
    %422 = arith.addf %419, %421 : vector<2x8xf32>
    %c0_213 = arith.constant 0 : index
    %c0_214 = arith.constant 0 : index
    %423 = vector.load %arg27[%c0_213, %c0_214] : memref<2x8xf32, #tpu.memory_space<vmem>>, vector<2x8xf32>
    tpu.vector_store %arg27[%c0_213, %c0_214], %422 {strides = array<i32>} : memref<2x8xf32, #tpu.memory_space<vmem>>, vector<2x8xf32>,
    return
  }
}

</mosaic_0001>

<bundles_post_ra>
// kernel: tpu_custom_call.1
= control target key start
LH: loop header
LB: loop body
LE: loop exit
PB: predicated region body
PF: predicated region fallthrough
CT: control target
= control target key end

     0   :  { %s4876_s0 = inlined_call_operand.vmem [shape: f32[8,192], index: 0, kind: input, shape index: {}]   ;;  %s4877_s1 = inlined_call_operand.vmem [shape: f32[192,32], index: 1, kind: input, shape index: {}]   ;;  %s4878_s2 = inlined_call_operand.vmem [shape: f32[10,32], index: 2, kind: input, shape index: {}]   ;;  %s4879_s3 = inlined_call_operand.vmem [shape: f32[10,10], index: 3, kind: input, shape index: {}]   ;;  %s4880_s4 = inlined_call_operand.vmem [shape: f32[1,32], index: 4, kind: input, shape index: {}]   ;;  %s4881_s5 = inlined_call_operand.vmem [shape: f32[1,32], index: 5, kind: input, shape index: {}]   ;;  %s4882_s6 = inlined_call_operand.vmem [shape: f32[2,1,32], index: 6, kind: input, shape index: {}]   ;;  %s4883_s7 = inlined_call_operand.vmem [shape: f32[2,1,32], index: 7, kind: input, shape index: {}]   ;;  %s4884_s8 = inlined_call_operand.vmem [shape: f32[2,2,32,16], index: 8, kind: input, shape index: {}]   ;;  %s4885_s9 = inlined_call_operand.vmem [shape: f32[2,2,32,16], index: 9, kind: input, shape index: {}]   ;;  %s4886_s10 = inlined_call_operand.vmem [shape: f32[2,2,32,16], index: 10, kind: input, shape index: {}]   ;;  %s4887_s11 = inlined_call_operand.vmem [shape: f32[2,2,1,16], index: 11, kind: input, shape index: {}]   ;;  %s4888_s12 = inlined_call_operand.vmem [shape: f32[2,2,1,16], index: 12, kind: input, shape index: {}]   ;;  %s4889_s13 = inlined_call_operand.vmem [shape: f32[2,2,1,16], index: 13, kind: input, shape index: {}]   ;;  %s4890_s14 = inlined_call_operand.vmem [shape: f32[2,2,16,32], index: 14, kind: input, shape index: {}]   ;;  %s4891_s15 = inlined_call_operand.vmem [shape: f32[2,1,32], index: 15, kind: input, shape index: {}]   ;;  %s4892_s16 = inlined_call_operand.vmem [shape: f32[2,1,32], index: 16, kind: input, shape index: {}]   ;;  %s4893_s17 = inlined_call_operand.vmem [shape: f32[2,1,32], index: 17, kind: input, shape index: {}]   ;;  %s4894_s18 = inlined_call_operand.vmem [shape: f32[2,32,128], index: 18, kind: input, shape index: {}]   ;;  %s4895_s19 = inlined_call_operand.vmem [shape: f32[2,1,128], index: 19, kind: input, shape index: {}]   ;;  %s4896_s20 = inlined_call_operand.vmem [shape: f32[2,128,32], index: 20, kind: input, shape index: {}]   ;;  %s4897_s21 = inlined_call_operand.vmem [shape: f32[2,1,32], index: 21, kind: input, shape index: {}]   ;;  %s4898_s22 = inlined_call_operand.vmem [shape: f32[1,32], index: 22, kind: input, shape index: {}]   ;;  %s4899_s23 = inlined_call_operand.vmem [shape: f32[1,32], index: 23, kind: input, shape index: {}]   ;;  %s4900_s24 = inlined_call_operand.vmem [shape: f32[32,16], index: 24, kind: input, shape index: {}]   ;;  %s4901_s25 = inlined_call_operand.vmem [shape: f32[16,8], index: 25, kind: input, shape index: {}]   ;;  %s4902_s26 = inlined_call_operand.vmem [shape: f32[1,8], index: 26, kind: input, shape index: {}]   ;;  %s4903_s27 = inlined_call_operand.hbm [shape: f32[2,8], index: 27, kind: output, shape index: {}]  }
   0x1   :  { %4914 = sst [smem:[#allocation6_spill]] %s4876_s0 }
   0x2   :  { %4915 = sst [smem:[#allocation7_spill]] %s4877_s1 }
   0x3   :  { %4916 = sst [smem:[#allocation8_spill]] %s4878_s2 }
   0x4   :  { %4917 = sst [smem:[#allocation9_spill]] %s4879_s3 }
   0x5   :  { %4918 = sst [smem:[#allocation10_spill]] %s4880_s4 }
   0x6   :  { %4919 = sst [smem:[#allocation11_spill]] %s4881_s5 }
   0x7   :  { %4920 = sst [smem:[#allocation12_spill]] %s4882_s6 }
   0x8   :  { %4921 = sst [smem:[#allocation13_spill]] %s4883_s7 }
   0x9   :  { %4922 = sst [smem:[#allocation14_spill]] %s4884_s8 }
   0xa   :  { %4923 = sst [smem:[#allocation15_spill]] %s4885_s9 }
   0xb   :  { %4924 = sst [smem:[#allocation16_spill]] %s4886_s10 }
   0xc   :  { %4925 = sst [smem:[#allocation17_spill]] %s4887_s11 }
   0xd   :  { %s4926_s8 = sld [smem:[#allocation7_spill]]  ;;  %v4004_v1 = vmov 0.0   ;;  %vm113_vm0 = vcmask 523264  }
   0xe   :  { %117 = vmatprep.subr.mxu0 %v4004_v1  ;;  %s4927_s2 = sld [smem:[#allocation6_spill]] }
  0x13   :  { %v104_v0 = vld [vmem:[%s4926_s8 + $0x78] sm:$0xff]  ;;  %v103_v2 = vld [vmem:[%s4926_s8 + $0x70] sm:$0xff]  ;;  %v102_v3 = vld [vmem:[%s4926_s8 + $0x68] sm:$0xff] }
  0x14   :  { %118 = vmatpush1.msra.mxu0 %v104_v0  ;;  %v101_v4 = vld [vmem:[%s4926_s8 + $0x60] sm:$0xff]  ;;  %v100_v5 = vld [vmem:[%s4926_s8 + $0x58] sm:$0xff]  ;;  %v88_v6 = vld [vmem:[%s4927_s2 + $0x8] sm:$0xff] }
  0x15   :  { %119 = vmatprep.subr.mxu0 %v4004_v1 }
  0x16   :  { %120 = vmatpush1.msra.mxu0 %v103_v2 }
  0x17   :  { %121 = vmatprep.subr.mxu0 %v4004_v1 }
  0x18   :  { %122 = vmatpush1.msra.mxu0 %v102_v3 }
  0x19   :  { %123 = vmatprep.subr.mxu0 %v4004_v1 }
  0x1a   :  { %124 = vmatpush1.msra.mxu0 %v101_v4 }
  0x1b   :  { %32 = vsyncpa [#allocation4], 0  ;;  %125 = vmatprep.subr.mxu0 %v4004_v1  ;;  %v99_v7 = vld [vmem:[%s4926_s8 + $0x50] sm:$0xff]  ;;  %3244 = vmatprep.mubr.msk.f32.mxu0 %vm113_vm0, %v88_v6  ;;  %v98_v8 = vld [vmem:[%s4926_s8 + $0x48] sm:$0xff]  ;;  %s4928_s30 = sld [smem:[#allocation8_spill]]  ;;  %vm189_vm1 = vcmask 261120  }
  0x1c   :  { %126 = vmatpush1.msra.mxu0 %v100_v5  ;;  %v97_v9 = vld [vmem:[%s4926_s8 + $0x40] sm:$0xff]  ;;  %v96_v10 = vld [vmem:[%s4926_s8 + $0x38] sm:$0xff]  ;;  %v95_v11 = vld [vmem:[%s4926_s8 + $0x30] sm:$0xff]  ;;  %vm191_vm2 = vcmask 254976   ;;  %vm195_vm3 = vcmask 257024   ;;  %s4929_s1 = sld [smem:[#allocation10_spill]] }
  0x1d   :  { %127 = vmatprep.subr.mxu0 %v4004_v1  ;;  %v94_v12 = vld [vmem:[%s4926_s8 + $0x28] sm:$0xff]  ;;  %v93_v13 = vld [vmem:[%s4926_s8 + $0x20] sm:$0xff]  ;;  %v92_v14 = vld [vmem:[%s4926_s8 + $0x18] sm:$0xff]  ;;  %s4930_s3 = sld [smem:[#allocation11_spill]]  ;;  %vm579_vm4 = vcmask 130048   ;;  %vm697_vm5 = vcmask 1041408  }
  0x1e   :  { %128 = vmatpush1.msra.mxu0 %v99_v7  ;;  %v91_v15 = vld [vmem:[%s4926_s8 + $0x10] sm:$0xff]  ;;  %v90_v16 = vld [vmem:[%s4926_s8 + $0x8] sm:$0xff]  ;;  %v89_v17 = vld [vmem:[%s4926_s8] sm:$0xff]  ;;  %s4933_s28 = sld [smem:[#allocation16_spill]]  ;;  %vm671_vm6 = vcmask 74752   ;;  %vm667_vm7 = vcmask 80896  }
  0x1f   :  { %129 = vmatprep.subr.mxu0 %v4004_v1  ;;  %v112_v18 = vld [vmem:[%s4926_s8 + $0xb8] sm:$0xff]  ;;  %v111_v19 = vld [vmem:[%s4926_s8 + $0xb0] sm:$0xff]  ;;  %v110_v20 = vld [vmem:[%s4926_s8 + $0xa8] sm:$0xff]  ;;  %s4934_s6 = sld [smem:[#allocation12_spill]]  ;;  %vm3038_vm8 = vcmask 1040384   ;;  %vm4005_vm9 = vmmov 0  }
  0x20   :  { %130 = vmatpush1.msra.mxu0 %v98_v8  ;;  %v109_v21 = vld [vmem:[%s4926_s8 + $0xa0] sm:$0xff]  ;;  %v108_v22 = vld [vmem:[%s4926_s8 + $0x98] sm:$0xff]  ;;  %v107_v23 = vld [vmem:[%s4926_s8 + $0x90] sm:$0xff]  ;;  %s4935_s7 = sld [smem:[#allocation13_spill]]  ;;  %vm3228_vm10 = vcmask 58368  }
  0x21   :  { %131 = vmatprep.subr.mxu0 %v4004_v1  ;;  %v106_v24 = vld [vmem:[%s4926_s8 + $0x88] sm:$0xff]  ;;  %v105_v25 = vld [vmem:[%s4926_s8 + $0x80] sm:$0xff]  ;;  %s4932_s8 = sld [smem:[#allocation15_spill]] }
  0x22   :  { %132 = vmatpush1.msra.mxu0 %v97_v9  ;;  %v87_v26 = vld [vmem:[%s4927_s2] sm:$0xff]  ;;  %v188_v28 = vld [vmem:[%s4928_s30 + $0x8] sm:$0x3]  ;;  %s4936_s29 = sld [smem:[#allocation17_spill]] }
  0x23   :  { %133 = vmatprep.subr.mxu0 %v4004_v1  ;;  %v187_v27 = vld [vmem:[%s4928_s30] sm:$0xff]  ;;  %192 = vst.msk [vmem:[#allocation2 + $0x8] sm:$0x3] %vm191_vm2, %v188_v28  ;;  %s4937_s2 = sld [smem:[#allocation9_spill]] }
  0x24   :  { %134 = vmatpush1.msra.mxu0 %v96_v10  ;;  %190 = vst.msk [vmem:[#allocation2] sm:$0xff] %vm189_vm1, %v187_v27  ;;  %v193_v29 = vld [vmem:[%s4928_s30 + $0x1] sm:$0xf]  ;;  %v197_v31 = vld [vmem:[%s4928_s30 + $0x6] sm:$0xf]  ;;  %s4931_s30 = sld [smem:[#allocation14_spill]] }
  0x25   :  { %135 = vmatprep.subr.mxu0 %v4004_v1  ;;  %v3245_v57 = vld [vmem:[%s4929_s1] ss:$0 sm:$0xff] }
  0x26   :  { %136 = vmatpush1.msra.mxu0 %v95_v11  ;;  %v3246_v59 = vld [vmem:[%s4930_s3] ss:$0 sm:$0xff] }
  0x27   :  { %137 = vmatprep.subr.mxu0 %v4004_v1 }
  0x28   :  { %138 = vmatpush1.msra.mxu0 %v94_v12 }
  0x29   :  { %139 = vmatprep.subr.mxu0 %v4004_v1 }
  0x2a   :  { %140 = vmatpush1.msra.mxu0 %v93_v13 }
  0x2b   :  { %141 = vmatprep.subr.mxu0 %v4004_v1 }
  0x2c   :  { %142 = vmatpush1.msra.mxu0 %v92_v14 }
  0x2d   :  { %143 = vmatprep.subr.mxu0 %v4004_v1 }
  0x2e   :  { %144 = vmatpush1.msra.mxu0 %v91_v15  ;;  %v299_v15 = vld [vmem:[%s4931_s30 + $0x18] sm:$0xff] }
  0x2f   :  { %145 = vmatprep.subr.mxu0 %v4004_v1 }
  0x30   :  { %146 = vmatpush1.msra.mxu0 %v90_v16  ;;  %v307_v16 = vld [vmem:[%s4932_s8 + $0x18] sm:$0xff] }
  0x31   :  { %147 = vmatprep.subr.mxu0 %v4004_v1  ;;  %3594 = vmatprep.subr.mxu1 %v307_v16 }
  0x32   :  { %148 = vmatpush1.msra.mxu0 %v89_v17  ;;  %3595 = vmatpush3.msra.mxu1 %v307_v16  ;;  %v298_v17 = vld [vmem:[%s4931_s30 + $0x10] sm:$0xff] }
  0x33   :  { %165 = vmatprep.subr.mxu0 %v4004_v1 }
  0x34   :  { %166 = vmatpush2.msra.mxu0 %v112_v18  ;;  %v306_v18 = vld [vmem:[%s4932_s8 + $0x10] sm:$0xff] }
  0x35   :  { %167 = vmatprep.subr.mxu0 %v4004_v1  ;;  %3596 = vmatprep.subr.mxu1 %v306_v18 }
  0x36   :  { %168 = vmatpush2.msra.mxu0 %v111_v19  ;;  %3597 = vmatpush3.msra.mxu1 %v306_v18  ;;  %v297_v19 = vld [vmem:[%s4931_s30 + $0x8] sm:$0xff] }
  0x37   :  { %169 = vmatprep.subr.mxu0 %v4004_v1 }
  0x38   :  { %170 = vmatpush2.msra.mxu0 %v110_v20  ;;  %v305_v20 = vld [vmem:[%s4932_s8 + $0x8] sm:$0xff] }
  0x39   :  { %171 = vmatprep.subr.mxu0 %v4004_v1  ;;  %3598 = vmatprep.subr.mxu1 %v305_v20 }
  0x3a   :  { %172 = vmatpush2.msra.mxu0 %v109_v21  ;;  %3599 = vmatpush3.msra.mxu1 %v305_v20  ;;  %v296_v21 = vld [vmem:[%s4931_s30] sm:$0xff] }
  0x3b   :  { %173 = vmatprep.subr.mxu0 %v4004_v1 }
  0x3c   :  { %174 = vmatpush2.msra.mxu0 %v108_v22  ;;  %v304_v22 = vld [vmem:[%s4932_s8] sm:$0xff] }
  0x3d   :  { %175 = vmatprep.subr.mxu0 %v4004_v1  ;;  %3600 = vmatprep.subr.mxu1 %v304_v22 }
  0x3e   :  { %176 = vmatpush2.msra.mxu0 %v107_v23  ;;  %v315_v23 = vld [vmem:[%s4933_s28 + $0x18] sm:$0xff]  ;;  %3601 = vmatpush3.msra.mxu1 %v304_v22 }
  0x3f   :  { %177 = vmatprep.subr.mxu0 %v4004_v1  ;;  %3605 = vmatprep.subr.mxu1 %v315_v23 }
  0x40   :  { %178 = vmatpush2.msra.mxu0 %v106_v24  ;;  %v319_v24 = vld [vmem:[%s4933_s28 + $0x38] sm:$0xff] }
  0x41   :  { %179 = vmatprep.subr.mxu0 %v4004_v1 }
  0x42   :  { %180 = vmatpush2.msra.mxu0 %v105_v25 }
  0x43   :  { %182 = vmatmul.mubr.f32.vlgmr.msra.gmra.mxu0 %v87_v26  ;;  %3583 = vmatprep.subr.mxu0 %v299_v15 }
  0x44   :  { %3584 = vmatpush3.msra.mxu0 %v299_v15 }
  0x45   :  { %3585 = vmatprep.subr.mxu0 %v298_v17 }
  0x46   :  { %3586 = vmatpush3.msra.mxu0 %v298_v17 }
  0x47   :  { %3587 = vmatprep.subr.mxu0 %v297_v19 }
  0x48   :  { %3588 = vmatpush3.msra.mxu0 %v297_v19 }
  0x49   :  { %3589 = vmatprep.subr.mxu0 %v296_v21 }
  0x4a   :  { %3590 = vmatpush3.msra.mxu0 %v296_v21 }
  0x4b   :  { %3652 = vmatprep.subr.mxu0 %v319_v24 }
 0x103   :  { %v183_v30 = vpop.f32.mrf.mxu0 }
 0x104   :  { %v194_v32 = vadd.f32 %v193_v29, %v183_v30  ;;  %v199_v33 = vrot.slane %v183_v30, 4 }
 0x105   :  { %v185_v34 = vpop.f32.mrf.mxu0 }
 0x106   :  { %196 = vst.msk [vmem:[#allocation2 + $0x1] sm:$0xf] %vm195_vm3, %v194_v32  ;;  %v201_v35 = vadd.f32 %v199_v33, %v197_v31  ;;  %v3247_v32 = vld [vmem:[%s4934_s6] ss:$0 sm:$0xff] }
 0x107   :  { %v3248_v34 = vld [vmem:[%s4935_s7] ss:$0 sm:$0xff] }
 0x108   :  { %202 = vst.msk [vmem:[#allocation2 + $0x6] sm:$0xf] %vm195_vm3, %v201_v35 }
 0x10f   :  { %v203_v36 = vld [vmem:[#allocation2] sm:$0xff]  ;;  %v204_v38 = vld [vmem:[#allocation2 + $0x8] sm:$0x3] }
 0x110   :  { %v207_v37 = vsel %vm189_vm1, %v203_v36, 0.0  ;;  %v210_v39 = vsel %vm191_vm2, %v204_v38, 0.0 }
 0x111   :  { %208 = vadd.xlane.f32.xlu0 %v207_v37 }
 0x115   :  { %211 = vadd.xlane.f32.xlu0 %v210_v39 }
 0x19a   :  { %v209_v40 = vpop.xlane.xlu0 %208 }
 0x19b   :  { %v214_v41 = vmul.f32 0.03125, %v209_v40 }
 0x19d   :  { %v216_v42 = vsub.f32 %v203_v36, %v214_v41  ;;  %v314_v41 = vld [vmem:[%s4933_s28 + $0x10] sm:$0xff] }
 0x19e   :  { %v212_v43 = vpop.xlane.xlu0 %211 }
 0x19f   :  { %v215_v44 = vmul.f32 0.03125, %v212_v43  ;;  %v218_v45 = vmul.f32 %v216_v42, %v216_v42  ;;  %v313_v43 = vld [vmem:[%s4933_s28 + $0x8] sm:$0xff] }
 0x1a1   :  { %v217_v46 = vsub.f32 %v204_v38, %v215_v44  ;;  %v220_v47 = vsel %vm189_vm1, %v218_v45, 0.0  ;;  %v317_v44 = vld [vmem:[%s4933_s28 + $0x28] sm:$0xff]  ;;  %v312_v45 = vld [vmem:[%s4933_s28] sm:$0xff] }
 0x1a2   :  { %221 = vadd.xlane.f32.xlu1 %v220_v47  ;;  %v3252_v47 = vld [vmem:[%s4888_s12] ss:$0 sm:$0xff] }
 0x1a3   :  { %v219_v48 = vmul.f32 %v217_v46, %v217_v46 }
 0x1a5   :  { %v223_v49 = vsel %vm191_vm2, %v219_v48, 0.0 }
 0x1a6   :  { %224 = vadd.xlane.f32.xlu1 %v223_v49 }
 0x22b   :  { %v222_v50 = vpop.xlane.xlu1 %221 }
 0x22c   :  { %v226_v51 = vmul.f32 0.03125, %v222_v50 }
 0x22e   :  { %v228_v52 = vadd.f32 1e-05, %v226_v51  ;;  %v3249_v51 = vld [vmem:[%s4936_s29] ss:$0 sm:$0xff] }
 0x22f   :  { %v225_v53 = vpop.xlane.xlu1 %224 }
 0x230   :  { %3912 = vrsqrt.f32 %v228_v52  ;;  %v227_v54 = vmul.f32 0.03125, %v225_v53 }
 0x232   :  { %v229_v55 = vadd.f32 1e-05, %v227_v54 }
 0x234   :  { %3914 = vrsqrt.f32 %v229_v55 }
 0x23d   :  { %v3913_v56 = vpop.eup %3912 }
 0x23e   :  { %v232_v58 = vmul.f32 %v3913_v56, %v216_v42  ;;  %v318_v42 = vld [vmem:[%s4933_s28 + $0x30] sm:$0xff]  ;;  %v3255_v56 = vld [vmem:[%s4889_s13] ss:$0 sm:$0xff] }
 0x240   :  { %v240_v60 = vmul.f32 %v3245_v57, %v232_v58 }
 0x241   :  { %v3915_v61 = vpop.eup %3914 }
 0x242   :  { %v4273_v62 = vadd.f32 %v3246_v59, %v240_v60  ;;  %v233_v63 = vmul.f32 %v3915_v61, %v217_v46  ;;  %v316_v46 = vld [vmem:[%s4933_s28 + $0x20] sm:$0xff] }
 0x244   :  { %v254_v0 = vsel %vm189_vm1, %v4273_v62, 0.0  ;;  %v241_v2 = vmul.f32 %v3245_v57, %v233_v63  ;;  %v3271_v57 = vld [vmem:[%s4889_s13 + $0x1] ss:$0 sm:$0xff] }
 0x245   :  { %255 = vadd.xlane.f32.xlu0 %v254_v0 }
 0x246   :  { %v4277_v3 = vadd.f32 %v3246_v59, %v241_v2 }
 0x248   :  { %v257_v4 = vsel %vm191_vm2, %v4277_v3, 0.0 }
 0x249   :  { %258 = vadd.xlane.f32.xlu1 %v257_v4 }
 0x2ce   :  { %v256_v5 = vpop.xlane.xlu0 %255 }
 0x2cf   :  { %v260_v6 = vmul.f32 0.03125, %v256_v5 }
 0x2d1   :  { %v262_v7 = vsub.f32 %v4273_v62, %v260_v6  ;;  %v4384_v6 = vld [vmem:[%s4937_s2 + $0x8] sm:$0x3] }
 0x2d2   :  { %v259_v8 = vpop.xlane.xlu1 %258 }
 0x2d3   :  { %v261_v9 = vmul.f32 0.03125, %v259_v8  ;;  %v264_v10 = vmul.f32 %v262_v7, %v262_v7  ;;  %v4389_v8 = vld [vmem:[%s4937_s2] sm:$0xff] }
 0x2d5   :  { %v263_v11 = vsub.f32 %v4277_v3, %v261_v9  ;;  %v266_v12 = vsel %vm189_vm1, %v264_v10, 0.0 }
 0x2d6   :  { %267 = vadd.xlane.f32.xlu0 %v266_v12 }
 0x2d7   :  { %v265_v13 = vmul.f32 %v263_v11, %v263_v11 }
 0x2d9   :  { %v269_v14 = vsel %vm191_vm2, %v265_v13, 0.0 }
 0x2da   :  { %270 = vadd.xlane.f32.xlu1 %v269_v14 }
 0x35f   :  { %v268_v25 = vpop.xlane.xlu0 %267 }
 0x360   :  { %v272_v26 = vmul.f32 0.03125, %v268_v25 }
 0x362   :  { %v274_v27 = vadd.f32 1e-05, %v272_v26 }
 0x363   :  { %v271_v28 = vpop.xlane.xlu1 %270 }
 0x364   :  { %3916 = vrsqrt.f32 %v274_v27  ;;  %v273_v29 = vmul.f32 0.03125, %v271_v28 }
 0x366   :  { %v275_v30 = vadd.f32 1e-05, %v273_v29 }
 0x368   :  { %3918 = vrsqrt.f32 %v275_v30 }
 0x371   :  { %v3917_v31 = vpop.eup %3916 }
 0x372   :  { %v278_v33 = vmul.f32 %v3917_v31, %v262_v7  ;;  %v302_v31 = vld [vmem:[%s4931_s30 + $0x30] sm:$0xff] }
 0x374   :  { %v286_v35 = vmul.f32 %v3247_v32, %v278_v33  ;;  %v300_v33 = vld [vmem:[%s4931_s30 + $0x20] sm:$0xff] }
 0x375   :  { %v3919_v36 = vpop.eup %3918 }
 0x376   :  { %v279_v37 = vmul.f32 %v3919_v36, %v263_v11  ;;  %v4321_v38 = vadd.f32 %v3248_v34, %v286_v35  ;;  %v310_v35 = vld [vmem:[%s4932_s8 + $0x30] sm:$0xff]  ;;  %v309_v36 = vld [vmem:[%s4932_s8 + $0x28] sm:$0xff] }
 0x378   :  { %v287_v39 = vmul.f32 %v3247_v32, %v279_v37  ;;  %3591 = vmatprep.mubr.msk.f32.mxu0 %vm189_vm1, %v4321_v38  ;;  %3602 = vmatprep.mubr.msk.f32.mxu1 %vm189_vm1, %v4321_v38  ;;  %v301_v32 = vld [vmem:[%s4931_s30 + $0x28] sm:$0xff]  ;;  %v308_v37 = vld [vmem:[%s4932_s8 + $0x20] sm:$0xff] }
 0x37a   :  { %v4327_v40 = vadd.f32 %v3248_v34, %v287_v39  ;;  %v311_v34 = vld [vmem:[%s4932_s8 + $0x38] sm:$0xff] }
 0x37c   :  { %3592 = vmatmul.mubr.msk.f32.vlgmr.msra.gmra.mxu0 %vm189_vm1, %v4327_v40  ;;  %3603 = vmatmul.mubr.msk.f32.vlgmr.msra.gmra.mxu1 %vm189_vm1, %v4327_v40 }
 0x37d   :  { %3606 = vmatpush3.msra.mxu1 %v315_v23  ;;  %3653 = vmatpush3.msra.mxu0 %v319_v24  ;;  %v303_v24 = vld [vmem:[%s4931_s30 + $0x38] sm:$0xff] }
 0x37e   :  { %3607 = vmatprep.subr.mxu1 %v314_v41  ;;  %3613 = vmatprep.mubr.msk.f32.mxu1 %vm189_vm1, %v4321_v38 }
 0x37f   :  { %3654 = vmatprep.subr.mxu0 %v318_v42  ;;  %3660 = vmatprep.mubr.msk.f32.mxu0 %vm189_vm1, %v4321_v38 }
 0x380   :  { %3608 = vmatpush3.msra.mxu1 %v314_v41  ;;  %3655 = vmatpush3.msra.mxu0 %v318_v42  ;;  %v3265_v42 = vld [vmem:[%s4936_s29 + $0x1] ss:$0 sm:$0xff] }
 0x381   :  { %3609 = vmatprep.subr.mxu1 %v313_v43  ;;  %3656 = vmatprep.subr.mxu0 %v317_v44 }
 0x382   :  { %3610 = vmatpush3.msra.mxu1 %v313_v43  ;;  %3657 = vmatpush3.msra.mxu0 %v317_v44 }
 0x383   :  { %3611 = vmatprep.subr.mxu1 %v312_v45  ;;  %3658 = vmatprep.subr.mxu0 %v316_v46 }
 0x384   :  { %3612 = vmatpush3.msra.mxu1 %v312_v45  ;;  %3659 = vmatpush3.msra.mxu0 %v316_v46  ;;  %v3268_v45 = vld [vmem:[%s4888_s12 + $0x1] ss:$0 sm:$0xff] }
 0x385   :  { %3614 = vmatmul.mubr.msk.f32.vlgmr.msra.gmra.mxu1 %vm189_vm1, %v4327_v40  ;;  %3661 = vmatmul.mubr.msk.f32.vlgmr.msra.gmra.mxu0 %vm189_vm1, %v4327_v40 }
 0x43c   :  { %v3593_v48 = vpop.f32.mrf.mxu0  ;;  %v3604_v49 = vpop.f32.mrf.mxu1 }
 0x43d   :  { %v495_v50 = vadd.f32 %v3604_v49, %v3252_v47  ;;  %v414_v58 = vadd.f32 %v3593_v48, %v3249_v51 }
 0x43e   :  { %v408_v52 = vpop.f32.mrf.mxu0  ;;  %v489_v53 = vpop.f32.mrf.mxu1 }
 0x43f   :  { %v409_v54 = vadd.f32 %v3249_v51, %v408_v52  ;;  %v490_v55 = vadd.f32 %v3252_v47, %v489_v53  ;;  %3616 = vmatprep.subr.msk.mxu1 %vm579_vm4, %v495_v50  ;;  %v326_v51 = vld [vmem:[%s4890_s14] sm:$0xff] }
 0x440   :  { %3617 = vmatpush3.xpose.msk.msra.mxu1 %vm579_vm4, %v495_v50 }
 0x441   :  { %3618 = vmatprep.subr.msk.mxu1 %vm579_vm4, %v490_v55  ;;  %3620 = vmatprep.mubr.msk.f32.mxu1 %vm579_vm4, %v409_v54 }
 0x444   :  { %3619 = vmatpush3.xpose.msk.msra.mxu1 %vm579_vm4, %v490_v55 }
 0x445   :  { %v3615_v59 = vpop.f32.mrf.mxu1  ;;  %v3662_v60 = vpop.f32.mrf.mxu0 }
 0x446   :  { %v576_v61 = vadd.f32 %v3615_v59, %v3255_v56  ;;  %v1016_v63 = vadd.f32 %v3662_v60, %v3271_v57 }
 0x447   :  { %v570_v0 = vpop.f32.mrf.mxu1  ;;  %v1010_v2 = vpop.f32.mrf.mxu0  ;;  %3621 = vmatmul.mubr.msk.f32.vlgmr.msra.gmra.mxu1 %vm579_vm4, %v414_v58 }
 0x448   :  { %v571_v4 = vadd.f32 %v3255_v56, %v570_v0  ;;  %v1011_v5 = vadd.f32 %v3271_v57, %v1010_v2  ;;  %3623 = vmatprep.subr.msk.mxu1 %vm697_vm5, %v576_v61  ;;  %3670 = vmatprep.subr.msk.mxu0 %vm697_vm5, %v1016_v63 }
 0x449   :  { %3671 = vmatpush3.msk.msra.mxu0 %vm697_vm5, %v1016_v63  ;;  %3624 = vmatpush3.msk.msra.mxu1 %vm697_vm5, %v576_v61 }
 0x44a   :  { %3672 = vmatprep.subr.mxu0 %v1011_v5  ;;  %3625 = vmatprep.subr.mxu1 %v571_v4 }
 0x44b   :  { %3673 = vmatpush3.msra.mxu0 %v1011_v5  ;;  %3626 = vmatpush3.msra.mxu1 %v571_v4 }
 0x44c   :  { %3630 = vmatprep.subr.mxu1 %v303_v24 }
 0x507   :  { %v3622_v7 = vpop.f32.mrf.mxu1 }
 0x508   :  { %v664_v9 = vadd.f32 %v3622_v7, %v4384_v6 }
 0x509   :  { %v658_v10 = vpop.f32.mrf.mxu1 }
 0x50a   :  { %v659_v11 = vadd.f32 %v658_v10, %v4389_v8  ;;  %v672_v12 = vsel %vm671_vm6, %v664_v9, -inf }
 0x50b   :  { %673 = vmax.xlane.f32.xlu1 %v672_v12 }
 0x50c   :  { %v668_v13 = vsel %vm667_vm7, %v659_v11, -inf }
 0x50d   :  { %669 = vmax.xlane.f32.xlu0 %v668_v13 }
 0x594   :  { %v674_v14 = vpop.xlane.xlu1 %673 }
 0x595   :  { %v676_v15 = vsub.f32 %v664_v9, %v674_v14  ;;  %v329_v9 = vld [vmem:[%s4890_s14 + $0x18] sm:$0xff] }
 0x596   :  { %v670_v16 = vpop.xlane.xlu0 %669  ;;  %3677 = vmatprep.subr.mxu0 %v329_v9 }
 0x597   :  { %v679_v17 = vmul.f32 1.442695, %v676_v15  ;;  %v675_v18 = vsub.f32 %v659_v11, %v670_v16  ;;  %v328_v16 = vld [vmem:[%s4890_s14 + $0x10] sm:$0xff] }
 0x599   :  { %3920 = vpow2.f32 %v679_v17  ;;  %v677_v19 = vmul.f32 1.442695, %v675_v18 }
 0x59b   :  { %3922 = vpow2.f32 %v677_v19 }
 0x5a6   :  { %v3921_v20 = vpop.eup %3920 }
 0x5a7   :  { %v684_v21 = vsel %vm671_vm6, %v3921_v20, 0.0 }
 0x5a8   :  { %v3923_v22 = vpop.eup %3922  ;;  %685 = vadd.xlane.f32.xlu1 %v684_v21 }
 0x5a9   :  { %v681_v23 = vsel %vm667_vm7, %v3923_v22, 0.0 }
 0x5aa   :  { %682 = vadd.xlane.f32.xlu0 %v681_v23  ;;  %v3285_v23 = vld [vmem:[%s4891_s15] ss:$0 sm:$0xff] }
 0x631   :  { %v686_v25 = vpop.xlane.xlu1 %685 }
 0x632   :  { %3924 = vrcp.f32 %v686_v25 }
 0x633   :  { %v683_v26 = vpop.xlane.xlu0 %682 }
 0x634   :  { %3926 = vrcp.f32 %v683_v26 }
 0x63f   :  { %v3925_v27 = vpop.eup %3924 }
 0x640   :  { %v690_v30 = vmul.f32 %v3925_v27, %v3921_v20 }
 0x641   :  { %v3927_v28 = vpop.eup %3926 }
 0x642   :  { %v689_v29 = vmul.f32 %v3927_v28, %v3923_v22 }
 0x644   :  { %3627 = vmatprep.mubr.msk.f32.mxu1 %vm667_vm7, %v689_v29 }
 0x645   :  { %3628 = vmatmul.mubr.msk.f32.vlgmr.msra.gmra.mxu1 %vm667_vm7, %v690_v30 }
 0x646   :  { %3631 = vmatpush3.msra.mxu1 %v303_v24  ;;  %3638 = vmatprep.mubr.msk.f32.mxu1 %vm189_vm1, %v4321_v38 }
 0x647   :  { %3632 = vmatprep.subr.mxu1 %v302_v31 }
 0x648   :  { %3633 = vmatpush3.msra.mxu1 %v302_v31 }
 0x649   :  { %3634 = vmatprep.subr.mxu1 %v301_v32 }
 0x64a   :  { %3635 = vmatpush3.msra.mxu1 %v301_v32 }
 0x64b   :  { %3636 = vmatprep.subr.mxu1 %v300_v33 }
 0x64c   :  { %3637 = vmatpush3.msra.mxu1 %v300_v33 }
 0x64d   :  { %3639 = vmatmul.mubr.msk.f32.vlgmr.msra.gmra.mxu1 %vm189_vm1, %v4327_v40  ;;  %3641 = vmatprep.subr.mxu1 %v311_v34 }
 0x64e   :  { %3642 = vmatpush3.msra.mxu1 %v311_v34  ;;  %3649 = vmatprep.mubr.msk.f32.mxu1 %vm189_vm1, %v4321_v38 }
 0x64f   :  { %3643 = vmatprep.subr.mxu1 %v310_v35 }
 0x650   :  { %3644 = vmatpush3.msra.mxu1 %v310_v35 }
 0x651   :  { %3645 = vmatprep.subr.mxu1 %v309_v36 }
 0x652   :  { %3646 = vmatpush3.msra.mxu1 %v309_v36 }
 0x653   :  { %3647 = vmatprep.subr.mxu1 %v308_v37 }
 0x654   :  { %3648 = vmatpush3.msra.mxu1 %v308_v37 }
 0x655   :  { %3650 = vmatmul.mubr.msk.f32.vlgmr.msra.gmra.mxu1 %vm189_vm1, %v4327_v40  ;;  %v327_v40 = vld [vmem:[%s4890_s14 + $0x8] sm:$0xff] }
 0x705   :  { %v3629_v39 = vpop.f32.mrf.mxu1 }
 0x707   :  { %v767_v41 = vpop.f32.mrf.mxu1 }
 0x70d   :  { %v3640_v38 = vpop.f32.mrf.mxu1 }
 0x70e   :  { %v854_v50 = vadd.f32 %v3640_v38, %v3265_v42  ;;  %v1432_v38 = vld [vmem:[%s4894_s18 + $0x18] sm:$0xff] }
 0x70f   :  { %v848_v43 = vpop.f32.mrf.mxu1 }
 0x710   :  { %v849_v44 = vadd.f32 %v3265_v42, %v848_v43  ;;  %v1431_v42 = vld [vmem:[%s4894_s18 + $0x10] sm:$0xff]  ;;  %v1430_v43 = vld [vmem:[%s4894_s18 + $0x8] sm:$0xff] }
 0x712   :  { %3667 = vmatprep.mubr.msk.f32.mxu1 %vm579_vm4, %v849_v44  ;;  %v1429_v44 = vld [vmem:[%s4894_s18] sm:$0xff] }
 0x715   :  { %v3651_v46 = vpop.f32.mrf.mxu1 }
 0x716   :  { %v935_v47 = vadd.f32 %v3651_v46, %v3268_v45 }
 0x717   :  { %v929_v48 = vpop.f32.mrf.mxu1 }
 0x718   :  { %v930_v49 = vadd.f32 %v3268_v45, %v929_v48  ;;  %3663 = vmatprep.subr.msk.mxu1 %vm579_vm4, %v935_v47 }
 0x719   :  { %3664 = vmatpush3.xpose.msk.msra.mxu1 %vm579_vm4, %v935_v47 }
 0x71a   :  { %3665 = vmatprep.subr.msk.mxu1 %vm579_vm4, %v930_v49 }
 0x71d   :  { %3666 = vmatpush3.xpose.msk.msra.mxu1 %vm579_vm4, %v930_v49 }
 0x71e   :  { %3684 = vmatprep.subr.mxu1 %v327_v40 }
 0x720   :  { %3668 = vmatmul.mubr.msk.f32.vlgmr.msra.gmra.mxu1 %vm579_vm4, %v854_v50 }
 0x721   :  { %3685 = vmatpush3.msra.mxu1 %v327_v40  ;;  %3688 = vmatprep.mubr.msk.f32.mxu1 %vm579_vm4, %v767_v41 }
 0x722   :  { %3686 = vmatprep.subr.mxu1 %v326_v51 }
 0x723   :  { %3687 = vmatpush3.msra.mxu1 %v326_v51  ;;  %v3286_v51 = vld [vmem:[%s4892_s16] ss:$0 sm:$0xff] }
 0x724   :  { %3689 = vmatmul.mubr.msk.f32.vlgmr.msra.gmra.mxu1 %vm579_vm4, %v3629_v39 }
 0x7e0   :  { %v3669_v52 = vpop.f32.mrf.mxu1 }
 0x7e1   :  { %v1103_v53 = vadd.f32 %v3669_v52, %v4384_v6 }
 0x7e2   :  { %v1097_v54 = vpop.f32.mrf.mxu1 }
 0x7e3   :  { %v1098_v55 = vadd.f32 %v1097_v54, %v4389_v8  ;;  %v1109_v56 = vsel %vm671_vm6, %v1103_v53, -inf }
 0x7e4   :  { %1110 = vmax.xlane.f32.xlu1 %v1109_v56  ;;  %v3690_v19 = vpop.f32.mrf.mxu1  ;;  %v3287_v56 = vld [vmem:[%s4893_s17] ss:$0 sm:$0xff] }
 0x7e5   :  { %v1106_v57 = vsel %vm667_vm7, %v1098_v55, -inf }
 0x7e6   :  { %1107 = vmax.xlane.f32.xlu0 %v1106_v57  ;;  %v1365_v22 = vpop.f32.mrf.mxu1 }
 0x86d   :  { %v1111_v58 = vpop.xlane.xlu1 %1110 }
 0x86e   :  { %v1113_v59 = vsub.f32 %v1103_v53, %v1111_v58 }
 0x86f   :  { %v1108_v60 = vpop.xlane.xlu0 %1107 }
 0x870   :  { %v1116_v61 = vmul.f32 1.442695, %v1113_v59  ;;  %v1112_v63 = vsub.f32 %v1098_v55, %v1108_v60  ;;  %v1552_v60 = vld [vmem:[%s4896_s20 + $0x78] sm:$0xff] }
 0x871   :  { %3702 = vmatprep.subr.mxu1 %v1552_v60 }
 0x872   :  { %3928 = vpow2.f32 %v1116_v61  ;;  %v1114_v0 = vmul.f32 1.442695, %v1112_v63  ;;  %3703 = vmatpush3.msra.mxu1 %v1552_v60  ;;  %v1551_v61 = vld [vmem:[%s4896_s20 + $0x70] sm:$0xff]  ;;  %v1550_v63 = vld [vmem:[%s4896_s20 + $0x68] sm:$0xff] }
 0x873   :  { %3704 = vmatprep.subr.mxu1 %v1551_v61 }
 0x874   :  { %3930 = vpow2.f32 %v1114_v0  ;;  %3705 = vmatpush3.msra.mxu1 %v1551_v61  ;;  %v1549_v0 = vld [vmem:[%s4896_s20 + $0x60] sm:$0xff] }
 0x875   :  { %3706 = vmatprep.subr.mxu1 %v1550_v63 }
 0x876   :  { %3707 = vmatpush3.msra.mxu1 %v1550_v63 }
 0x877   :  { %3708 = vmatprep.subr.mxu1 %v1549_v0 }
 0x878   :  { %3709 = vmatpush3.msra.mxu1 %v1549_v0  ;;  %v3296_v0 = vld [vmem:[%s4934_s6 + $0x1] ss:$0 sm:$0xff] }
 0x87f   :  { %v3929_v2 = vpop.eup %3928 }
 0x880   :  { %v1121_v4 = vsel %vm671_vm6, %v3929_v2, 0.0 }
 0x881   :  { %v3931_v5 = vpop.eup %3930  ;;  %1122 = vadd.xlane.f32.xlu1 %v1121_v4  ;;  %v1547_v4 = vld [vmem:[%s4896_s20 + $0x50] sm:$0xff] }
 0x882   :  { %v1118_v7 = vsel %vm667_vm7, %v3931_v5, 0.0 }
 0x883   :  { %1119 = vadd.xlane.f32.xlu0 %v1118_v7  ;;  %v1545_v7 = vld [vmem:[%s4896_s20 + $0x40] sm:$0xff] }
 0x90a   :  { %v1123_v10 = vpop.xlane.xlu1 %1122 }
 0x90b   :  { %3932 = vrcp.f32 %v1123_v10  ;;  %v1543_v10 = vld [vmem:[%s4896_s20 + $0x30] sm:$0xff] }
 0x90c   :  { %v1120_v11 = vpop.xlane.xlu0 %1119 }
 0x90d   :  { %3934 = vrcp.f32 %v1120_v11  ;;  %v1542_v11 = vld [vmem:[%s4896_s20 + $0x28] sm:$0xff] }
 0x918   :  { %v3933_v12 = vpop.eup %3932 }
 0x919   :  { %v1127_v15 = vmul.f32 %v3933_v12, %v3929_v2  ;;  %v1548_v2 = vld [vmem:[%s4896_s20 + $0x58] sm:$0xff]  ;;  %v1541_v12 = vld [vmem:[%s4896_s20 + $0x20] sm:$0xff] }
 0x91a   :  { %v3935_v13 = vpop.eup %3934  ;;  %3710 = vmatprep.subr.mxu1 %v1548_v2 }
 0x91b   :  { %v1126_v14 = vmul.f32 %v3935_v13, %v3931_v5  ;;  %3711 = vmatpush3.msra.mxu1 %v1548_v2  ;;  %v1546_v5 = vld [vmem:[%s4896_s20 + $0x48] sm:$0xff]  ;;  %v1540_v13 = vld [vmem:[%s4896_s20 + $0x18] sm:$0xff] }
 0x91c   :  { %3712 = vmatprep.subr.mxu1 %v1547_v4 }
 0x91d   :  { %3674 = vmatprep.mubr.msk.f32.mxu0 %vm667_vm7, %v1126_v14  ;;  %3713 = vmatpush3.msra.mxu1 %v1547_v4  ;;  %v1539_v14 = vld [vmem:[%s4896_s20 + $0x10] sm:$0xff] }
 0x91e   :  { %3675 = vmatmul.mubr.msk.f32.vlgmr.msra.gmra.mxu0 %vm667_vm7, %v1127_v15  ;;  %3714 = vmatprep.subr.mxu1 %v1546_v5  ;;  %v1538_v15 = vld [vmem:[%s4896_s20 + $0x8] sm:$0xff] }
 0x91f   :  { %3678 = vmatpush3.msra.mxu0 %v329_v9  ;;  %3715 = vmatpush3.msra.mxu1 %v1546_v5  ;;  %v1544_v9 = vld [vmem:[%s4896_s20 + $0x38] sm:$0xff] }
 0x920   :  { %3679 = vmatprep.subr.mxu0 %v328_v16  ;;  %3716 = vmatprep.subr.mxu1 %v1545_v7 }
 0x921   :  { %3680 = vmatpush3.msra.mxu0 %v328_v16  ;;  %3717 = vmatpush3.msra.mxu1 %v1545_v7  ;;  %v1537_v16 = vld [vmem:[%s4896_s20] sm:$0xff] }
 0x922   :  { %3691 = vmatprep.subr.mxu0 %v1432_v38  ;;  %3718 = vmatprep.subr.mxu1 %v1544_v9 }
 0x923   :  { %3719 = vmatpush3.msra.mxu1 %v1544_v9 }
 0x924   :  { %3720 = vmatprep.subr.mxu1 %v1543_v10 }
 0x925   :  { %3721 = vmatpush3.msra.mxu1 %v1543_v10  ;;  %v3297_v10 = vld [vmem:[%s4935_s7 + $0x1] ss:$0 sm:$0xff] }
 0x926   :  { %3722 = vmatprep.subr.mxu1 %v1542_v11 }
 0x927   :  { %3723 = vmatpush3.msra.mxu1 %v1542_v11 }
 0x928   :  { %3724 = vmatprep.subr.mxu1 %v1541_v12 }
 0x929   :  { %3725 = vmatpush3.msra.mxu1 %v1541_v12 }
 0x92a   :  { %3726 = vmatprep.subr.mxu1 %v1540_v13 }
 0x92b   :  { %3727 = vmatpush3.msra.mxu1 %v1540_v13  ;;  %v3308_v13 = vld [vmem:[%s4932_s8 + $0x50] sm:$0xff] }
 0x92c   :  { %3728 = vmatprep.subr.mxu1 %v1539_v14 }
 0x92d   :  { %3729 = vmatpush3.msra.mxu1 %v1539_v14  ;;  %v3307_v14 = vld [vmem:[%s4932_s8 + $0x48] sm:$0xff] }
 0x92e   :  { %3730 = vmatprep.subr.mxu1 %v1538_v15 }
 0x92f   :  { %3731 = vmatpush3.msra.mxu1 %v1538_v15  ;;  %v3306_v15 = vld [vmem:[%s4932_s8 + $0x40] sm:$0xff] }
 0x930   :  { %3732 = vmatprep.subr.mxu1 %v1537_v16 }
 0x931   :  { %3733 = vmatpush3.msra.mxu1 %v1537_v16  ;;  %v3317_v16 = vld [vmem:[%s4933_s28 + $0x58] sm:$0xff] }
 0x9de   :  { %v3676_v17 = vpop.f32.mrf.mxu0 }
 0x9e0   :  { %v1203_v18 = vpop.f32.mrf.mxu0 }
 0x9e1   :  { %3681 = vmatprep.mubr.msk.f32.mxu0 %vm579_vm4, %v1203_v18 }
 0x9e2   :  { %3682 = vmatmul.mubr.msk.f32.vlgmr.msra.gmra.mxu0 %vm579_vm4, %v3676_v17  ;;  %v3288_v17 = vld [vmem:[%s4895_s19] ss:$0 sm:$0xff] }
 0x9e3   :  { %3692 = vmatpush3.msra.mxu0 %v1432_v38 }
 0x9e4   :  { %3693 = vmatprep.subr.mxu0 %v1431_v42 }
 0x9e5   :  { %3694 = vmatpush3.msra.mxu0 %v1431_v42 }
 0x9e6   :  { %3695 = vmatprep.subr.mxu0 %v1430_v43 }
 0x9e7   :  { %3696 = vmatpush3.msra.mxu0 %v1430_v43 }
 0x9e8   :  { %3697 = vmatprep.subr.mxu0 %v1429_v44 }
 0x9e9   :  { %3698 = vmatpush3.msra.mxu0 %v1429_v44 }
 0xaa2   :  { %v3683_v20 = vpop.f32.mrf.mxu0 }
 0xaa3   :  { %v1371_v21 = vadd.f32 %v3690_v19, %v3683_v20 }
 0xaa4   :  { %v1284_v24 = vpop.f32.mrf.mxu0 }
 0xaa5   :  { %v1375_v25 = vadd.f32 %v1371_v21, %v4277_v3  ;;  %v1366_v26 = vadd.f32 %v1365_v22, %v1284_v24 }
 0xaa7   :  { %v4471_v27 = vadd.f32 %v3285_v23, %v1375_v25  ;;  %v1374_v28 = vadd.f32 %v1366_v26, %v4273_v62 }
 0xaa9   :  { %v4474_v29 = vadd.f32 %v3285_v23, %v1374_v28  ;;  %v1390_v30 = vsel %vm191_vm2, %v4471_v27, 0.0 }
 0xaaa   :  { %1391 = vadd.xlane.f32.xlu1 %v1390_v30 }
 0xaab   :  { %v1387_v31 = vsel %vm189_vm1, %v4474_v29, 0.0 }
 0xaac   :  { %1388 = vadd.xlane.f32.xlu0 %v1387_v31 }
 0xb33   :  { %v1392_v32 = vpop.xlane.xlu1 %1391 }
 0xb34   :  { %v1394_v33 = vmul.f32 0.03125, %v1392_v32 }
 0xb35   :  { %v1389_v34 = vpop.xlane.xlu0 %1388 }
 0xb36   :  { %v1396_v3 = vsub.f32 %v4471_v27, %v1394_v33  ;;  %v1393_v35 = vmul.f32 0.03125, %v1389_v34 }
 0xb38   :  { %v1395_v36 = vsub.f32 %v4474_v29, %v1393_v35  ;;  %v1398_v37 = vmul.f32 %v1396_v3, %v1396_v3 }
 0xb3a   :  { %v1402_v62 = vsel %vm191_vm2, %v1398_v37, 0.0  ;;  %v1397_v39 = vmul.f32 %v1395_v36, %v1395_v36 }
 0xb3b   :  { %1403 = vadd.xlane.f32.xlu1 %v1402_v62 }
 0xb3c   :  { %v1399_v41 = vsel %vm189_vm1, %v1397_v39, 0.0 }
 0xb3d   :  { %1400 = vadd.xlane.f32.xlu0 %v1399_v41 }
 0xbc4   :  { %v1404_v45 = vpop.xlane.xlu1 %1403 }
 0xbc5   :  { %v1406_v46 = vmul.f32 0.03125, %v1404_v45 }
 0xbc6   :  { %v1401_v47 = vpop.xlane.xlu0 %1400 }
 0xbc7   :  { %v1408_v48 = vadd.f32 1e-05, %v1406_v46  ;;  %v1405_v49 = vmul.f32 0.03125, %v1401_v47 }
 0xbc9   :  { %3936 = vrsqrt.f32 %v1408_v48  ;;  %v1407_v40 = vadd.f32 1e-05, %v1405_v49 }
 0xbcb   :  { %3938 = vrsqrt.f32 %v1407_v40 }
 0xbd6   :  { %v3937_v50 = vpop.eup %3936 }
 0xbd7   :  { %v1412_v52 = vmul.f32 %v3937_v50, %v1396_v3 }
 0xbd8   :  { %v3939_v53 = vpop.eup %3938 }
 0xbd9   :  { %v1411_v54 = vmul.f32 %v3939_v53, %v1395_v36  ;;  %v1420_v55 = vmul.f32 %v3286_v51, %v1412_v52  ;;  %v3293_v36 = vld [vmem:[%s4897_s21] ss:$0 sm:$0xff]  ;;  %v3300_v52 = vld [vmem:[%s4931_s30 + $0x50] sm:$0xff]  ;;  %v3299_v53 = vld [vmem:[%s4931_s30 + $0x48] sm:$0xff] }
 0xbdb   :  { %v1419_v57 = vmul.f32 %v3286_v51, %v1411_v54  ;;  %v1428_v59 = vadd.f32 %v3287_v56, %v1420_v55  ;;  %v3301_v51 = vld [vmem:[%s4931_s30 + $0x58] sm:$0xff]  ;;  %v3298_v54 = vld [vmem:[%s4931_s30 + $0x40] sm:$0xff] }
 0xbdc   :  { %3737 = vmatprep.subr.mxu0 %v3301_v51  ;;  %v3309_v55 = vld [vmem:[%s4932_s8 + $0x58] sm:$0xff] }
 0xbdd   :  { %v1427_v58 = vadd.f32 %v3287_v56, %v1419_v57 }
 0xbdf   :  { %3699 = vmatprep.mubr.msk.f32.mxu0 %vm189_vm1, %v1427_v58 }
 0xbe0   :  { %3700 = vmatmul.mubr.msk.f32.vlgmr.msra.gmra.mxu0 %vm189_vm1, %v1428_v59 }
 0xbe1   :  { %3738 = vmatpush3.msra.mxu0 %v3301_v51 }
 0xbe2   :  { %3739 = vmatprep.subr.mxu0 %v3300_v52 }
 0xbe3   :  { %3740 = vmatpush3.msra.mxu0 %v3300_v52 }
 0xbe4   :  { %3741 = vmatprep.subr.mxu0 %v3299_v53 }
 0xbe5   :  { %3742 = vmatpush3.msra.mxu0 %v3299_v53 }
 0xbe6   :  { %3743 = vmatprep.subr.mxu0 %v3298_v54 }
 0xbe7   :  { %3744 = vmatpush3.msra.mxu0 %v3298_v54 }
 0xbe8   :  { %3748 = vmatprep.subr.mxu0 %v3309_v55 }
 0xca0   :  { %v3701_v18 = vpop.f32.mrf.mxu0 }
 0xca1   :  { %v1518_v19 = vadd.f32 %v3701_v18, %v3288_v17  ;;  %v3315_v18 = vld [vmem:[%s4933_s28 + $0x48] sm:$0xff] }
 0xca2   :  { %v1512_v20 = vpop.f32.mrf.mxu0 }
 0xca3   :  { %v3292_v21 = vmul.f32 -1.702, %v1518_v19  ;;  %v1513_v22 = vadd.f32 %v3288_v17, %v1512_v20  ;;  %v3316_v17 = vld [vmem:[%s4933_s28 + $0x50] sm:$0xff] }
 0xca5   :  { %v1527_v23 = vmul.f32 1.442695, %v3292_v21  ;;  %v3291_v24 = vmul.f32 -1.702, %v1513_v22  ;;  %v3332_v21 = vld [vmem:[%s4936_s29 + $0x2] ss:$0 sm:$0xff] }
 0xca7   :  { %3940 = vpow2.f32 %v1527_v23  ;;  %v1525_v25 = vmul.f32 1.442695, %v3291_v24  ;;  %v3335_v24 = vld [vmem:[%s4888_s12 + $0x2] ss:$0 sm:$0xff] }
 0xca9   :  { %3942 = vpow2.f32 %v1525_v25 }
 0xcb4   :  { %v3941_v26 = vpop.eup %3940 }
 0xcb5   :  { %v1530_v28 = vadd.f32 1.0, %v3941_v26 }
 0xcb6   :  { %v3943_v30 = vpop.eup %3942 }
 0xcb7   :  { %v1529_v31 = vadd.f32 1.0, %v3943_v30  ;;  %3944 = vrcp.f32 %v1530_v28 }
 0xcb9   :  { %3946 = vrcp.f32 %v1529_v31  ;;  %v3338_v31 = vld [vmem:[%s4889_s13 + $0x2] ss:$0 sm:$0xff] }
 0xcc4   :  { %v3945_v32 = vpop.eup %3944 }
 0xcc5   :  { %v1536_v3 = vmul.f32 %v3945_v32, %v1518_v19  ;;  %v3314_v19 = vld [vmem:[%s4933_s28 + $0x40] sm:$0xff]  ;;  %v3313_v32 = vld [vmem:[%s4932_s8 + $0x78] sm:$0xff] }
 0xcc6   :  { %v3947_v33 = vpop.eup %3946 }
 0xcc7   :  { %v1535_v34 = vmul.f32 %v3947_v33, %v1513_v22 }
 0xcc9   :  { %3734 = vmatprep.mubr.f32.mxu1 %v1535_v34 }
 0xcca   :  { %3735 = vmatmul.mubr.f32.vlgmr.msra.gmra.mxu1 %v1536_v3 }
 0xd8a   :  { %v3736_v35 = vpop.f32.mrf.mxu1 }
 0xd8b   :  { %v1629_v37 = vadd.f32 %v3736_v35, %v4471_v27 }
 0xd8c   :  { %v1619_v62 = vpop.f32.mrf.mxu1 }
 0xd8d   :  { %v4559_v39 = vadd.f32 %v3293_v36, %v1629_v37  ;;  %v1628_v41 = vadd.f32 %v1619_v62, %v4474_v29  ;;  %v3312_v37 = vld [vmem:[%s4932_s8 + $0x70] sm:$0xff]  ;;  %v3311_v62 = vld [vmem:[%s4932_s8 + $0x68] sm:$0xff] }
 0xd8f   :  { %v4562_v38 = vadd.f32 %v3293_v36, %v1628_v41  ;;  %v1646_v42 = vsel %vm191_vm2, %v4559_v39, 0.0  ;;  %v3310_v41 = vld [vmem:[%s4932_s8 + $0x60] sm:$0xff] }
 0xd90   :  { %1647 = vadd.xlane.f32.xlu1 %v1646_v42 }
 0xd91   :  { %v1643_v43 = vsel %vm189_vm1, %v4562_v38, 0.0 }
 0xd92   :  { %1644 = vadd.xlane.f32.xlu0 %v1643_v43 }
 0xe19   :  { %v1648_v44 = vpop.xlane.xlu1 %1647 }
 0xe1a   :  { %v1650_v45 = vmul.f32 0.03125, %v1648_v44 }
 0xe1b   :  { %v1645_v46 = vpop.xlane.xlu0 %1644 }
 0xe1c   :  { %v1652_v27 = vsub.f32 %v4559_v39, %v1650_v45  ;;  %v1649_v47 = vmul.f32 0.03125, %v1645_v46 }
 0xe1e   :  { %v1651_v48 = vsub.f32 %v4562_v38, %v1649_v47  ;;  %v1654_v49 = vmul.f32 %v1652_v27, %v1652_v27  ;;  %v3351_v47 = vld [vmem:[%s4888_s12 + $0x3] ss:$0 sm:$0xff] }
 0xe20   :  { %v1658_v29 = vsel %vm191_vm2, %v1654_v49, 0.0  ;;  %v1653_v40 = vmul.f32 %v1651_v48, %v1651_v48 }
 0xe21   :  { %1659 = vadd.xlane.f32.xlu1 %v1658_v29 }
 0xe22   :  { %v1655_v50 = vsel %vm189_vm1, %v1653_v40, 0.0 }
 0xe23   :  { %1656 = vadd.xlane.f32.xlu0 %v1655_v50 }
 0xeaa   :  { %v1660_v56 = vpop.xlane.xlu1 %1659 }
 0xeab   :  { %v1662_v57 = vmul.f32 0.03125, %v1660_v56 }
 0xeac   :  { %v1657_v58 = vpop.xlane.xlu0 %1656 }
 0xead   :  { %v1664_v59 = vadd.f32 1e-05, %v1662_v57  ;;  %v1661_v60 = vmul.f32 0.03125, %v1657_v58 }
 0xeaf   :  { %3948 = vrsqrt.f32 %v1664_v59  ;;  %v1663_v61 = vadd.f32 1e-05, %v1661_v60  ;;  %v3305_v60 = vld [vmem:[%s4931_s30 + $0x78] sm:$0xff] }
 0xeb1   :  { %3950 = vrsqrt.f32 %v1663_v61 }
 0xebc   :  { %v3949_v63 = vpop.eup %3948 }
 0xebd   :  { %v1668_v2 = vmul.f32 %v3949_v63, %v1652_v27 }
 0xebe   :  { %v3951_v4 = vpop.eup %3950 }
 0xebf   :  { %v1667_v5 = vmul.f32 %v3951_v4, %v1651_v48  ;;  %v1676_v7 = vmul.f32 %v3296_v0, %v1668_v2 }
 0xec1   :  { %v1675_v9 = vmul.f32 %v3296_v0, %v1667_v5  ;;  %v4595_v12 = vadd.f32 %v3297_v10, %v1676_v7  ;;  %v3304_v7 = vld [vmem:[%s4931_s30 + $0x70] sm:$0xff] }
 0xec3   :  { %v4593_v11 = vadd.f32 %v3297_v10, %v1675_v9  ;;  %v3303_v9 = vld [vmem:[%s4931_s30 + $0x68] sm:$0xff]  ;;  %v3302_v10 = vld [vmem:[%s4931_s30 + $0x60] sm:$0xff] }
 0xec5   :  { %3745 = vmatprep.mubr.msk.f32.mxu0 %vm189_vm1, %v4593_v11 }
 0xec6   :  { %3746 = vmatmul.mubr.msk.f32.vlgmr.msra.gmra.mxu0 %vm189_vm1, %v4595_v12 }
 0xec7   :  { %3749 = vmatpush3.msra.mxu0 %v3309_v55  ;;  %3756 = vmatprep.mubr.msk.f32.mxu0 %vm189_vm1, %v4593_v11 }
 0xec8   :  { %3750 = vmatprep.subr.mxu0 %v3308_v13 }
 0xec9   :  { %3751 = vmatpush3.msra.mxu0 %v3308_v13  ;;  %v3321_v13 = vld [vmem:[%s4933_s28 + $0x78] sm:$0xff] }
 0xeca   :  { %3752 = vmatprep.subr.mxu0 %v3307_v14 }
 0xecb   :  { %3753 = vmatpush3.msra.mxu0 %v3307_v14  ;;  %v3320_v14 = vld [vmem:[%s4933_s28 + $0x70] sm:$0xff] }
 0xecc   :  { %3754 = vmatprep.subr.mxu0 %v3306_v15 }
 0xecd   :  { %3755 = vmatpush3.msra.mxu0 %v3306_v15  ;;  %v3319_v15 = vld [vmem:[%s4933_s28 + $0x68] sm:$0xff] }
 0xece   :  { %3757 = vmatmul.mubr.msk.f32.vlgmr.msra.gmra.mxu0 %vm189_vm1, %v4595_v12  ;;  %3759 = vmatprep.subr.mxu0 %v3317_v16 }
 0xecf   :  { %3760 = vmatpush3.msra.mxu0 %v3317_v16  ;;  %3767 = vmatprep.mubr.msk.f32.mxu0 %vm189_vm1, %v4593_v11  ;;  %v3318_v16 = vld [vmem:[%s4933_s28 + $0x60] sm:$0xff] }
 0xed0   :  { %3761 = vmatprep.subr.mxu0 %v3316_v17 }
 0xed1   :  { %3762 = vmatpush3.msra.mxu0 %v3316_v17 }
 0xed2   :  { %3763 = vmatprep.subr.mxu0 %v3315_v18 }
 0xed3   :  { %3764 = vmatpush3.msra.mxu0 %v3315_v18 }
 0xed4   :  { %3765 = vmatprep.subr.mxu0 %v3314_v19 }
 0xed5   :  { %3766 = vmatpush3.msra.mxu0 %v3314_v19  ;;  %v3348_v19 = vld [vmem:[%s4936_s29 + $0x3] ss:$0 sm:$0xff] }
 0xed6   :  { %3768 = vmatmul.mubr.msk.f32.vlgmr.msra.gmra.mxu0 %vm189_vm1, %v4595_v12 }
 0xf86   :  { %v3747_v20 = vpop.f32.mrf.mxu0 }
 0xf87   :  { %v1810_v34 = vadd.f32 %v3747_v20, %v3332_v21 }
 0xf88   :  { %v1804_v22 = vpop.f32.mrf.mxu0 }
 0xf89   :  { %v1805_v23 = vadd.f32 %v3332_v21, %v1804_v22 }
 0xf8b   :  { %3774 = vmatprep.mubr.msk.f32.mxu0 %vm579_vm4, %v1805_v23  ;;  %v3354_v23 = vld [vmem:[%s4889_s13 + $0x3] ss:$0 sm:$0xff] }
 0xf8e   :  { %v3758_v25 = vpop.f32.mrf.mxu0 }
 0xf8f   :  { %v1891_v26 = vadd.f32 %v3758_v25, %v3335_v24 }
 0xf90   :  { %v1885_v28 = vpop.f32.mrf.mxu0 }
 0xf91   :  { %v1886_v30 = vadd.f32 %v3335_v24, %v1885_v28  ;;  %3770 = vmatprep.subr.msk.mxu0 %vm579_vm4, %v1891_v26 }
 0xf92   :  { %3771 = vmatpush3.xpose.msk.msra.mxu0 %vm579_vm4, %v1891_v26 }
 0xf93   :  { %3772 = vmatprep.subr.msk.mxu0 %vm579_vm4, %v1886_v30 }
 0xf96   :  { %v3769_v33 = vpop.f32.mrf.mxu0  ;;  %3773 = vmatpush3.xpose.msk.msra.mxu0 %vm579_vm4, %v1886_v30 }
 0xf97   :  { %v1972_v3 = vadd.f32 %v3769_v33, %v3338_v31  ;;  %3795 = vmatprep.subr.mxu0 %v3313_v32 }
 0xf98   :  { %v1966_v35 = vpop.f32.mrf.mxu0 }
 0xf99   :  { %v1967_v36 = vadd.f32 %v3338_v31, %v1966_v35  ;;  %3775 = vmatmul.mubr.msk.f32.vlgmr.msra.gmra.mxu0 %vm579_vm4, %v1810_v34  ;;  %3777 = vmatprep.subr.msk.mxu1 %vm697_vm5, %v1972_v3 }
 0xf9a   :  { %3778 = vmatpush3.msk.msra.mxu1 %vm697_vm5, %v1972_v3  ;;  %3796 = vmatpush3.msra.mxu0 %v3313_v32 }
 0xf9b   :  { %3803 = vmatprep.mubr.msk.f32.mxu0 %vm189_vm1, %v4593_v11  ;;  %3779 = vmatprep.subr.mxu1 %v1967_v36 }
 0xf9c   :  { %3797 = vmatprep.subr.mxu0 %v3312_v37  ;;  %3780 = vmatpush3.msra.mxu1 %v1967_v36 }
 0xf9d   :  { %3798 = vmatpush3.msra.mxu0 %v3312_v37  ;;  %3784 = vmatprep.subr.mxu1 %v3305_v60 }
 0xf9e   :  { %3799 = vmatprep.subr.mxu0 %v3311_v62 }
 0xf9f   :  { %3800 = vmatpush3.msra.mxu0 %v3311_v62 }
 0xfa0   :  { %3801 = vmatprep.subr.mxu0 %v3310_v41 }
 0xfa1   :  { %3802 = vmatpush3.msra.mxu0 %v3310_v41 }
 0xfa2   :  { %3804 = vmatmul.mubr.msk.f32.vlgmr.msra.gmra.mxu0 %vm189_vm1, %v4595_v12 }
0x1059   :  { %v3776_v42 = vpop.f32.mrf.mxu0 }
0x105a   :  { %v2059_v43 = vadd.f32 %v3776_v42, %v4384_v6 }
0x105b   :  { %v2053_v44 = vpop.f32.mrf.mxu0 }
0x105c   :  { %v2054_v45 = vadd.f32 %v2053_v44, %v4389_v8  ;;  %v2065_v46 = vsel %vm671_vm6, %v2059_v43, -inf  ;;  %v3329_v44 = vld [vmem:[%s4890_s14 + $0x28] sm:$0xff] }
0x105d   :  { %2066 = vmax.xlane.f32.xlu1 %v2065_v46 }
0x105e   :  { %v2062_v27 = vsel %vm667_vm7, %v2054_v45, -inf }
0x105f   :  { %2063 = vmax.xlane.f32.xlu0 %v2062_v27 }
0x1062   :  { %v3805_v48 = vpop.f32.mrf.mxu0 }
0x1063   :  { %v2327_v49 = vadd.f32 %v3805_v48, %v3351_v47 }
0x1064   :  { %v2321_v29 = vpop.f32.mrf.mxu0 }
0x1065   :  { %v2322_v40 = vadd.f32 %v3351_v47, %v2321_v29  ;;  %3817 = vmatprep.subr.msk.mxu0 %vm579_vm4, %v2327_v49 }
0x1066   :  { %3818 = vmatpush3.xpose.msk.msra.mxu0 %vm579_vm4, %v2327_v49 }
0x1067   :  { %3819 = vmatprep.subr.msk.mxu0 %vm579_vm4, %v2322_v40 }
0x106a   :  { %3820 = vmatpush3.xpose.msk.msra.mxu0 %vm579_vm4, %v2322_v40  ;;  %v3328_v40 = vld [vmem:[%s4890_s14 + $0x20] sm:$0xff] }
0x10e6   :  { %v2067_v50 = vpop.xlane.xlu1 %2066 }
0x10e7   :  { %v2069_v51 = vsub.f32 %v2059_v43, %v2067_v50  ;;  %v3330_v50 = vld [vmem:[%s4890_s14 + $0x30] sm:$0xff] }
0x10e8   :  { %v2064_v52 = vpop.xlane.xlu0 %2063 }
0x10e9   :  { %v2072_v53 = vmul.f32 1.442695, %v2069_v51  ;;  %v2068_v54 = vsub.f32 %v2054_v45, %v2064_v52  ;;  %v3331_v45 = vld [vmem:[%s4890_s14 + $0x38] sm:$0xff] }
0x10ea   :  { %3831 = vmatprep.subr.mxu0 %v3331_v45 }
0x10eb   :  { %3952 = vpow2.f32 %v2072_v53  ;;  %v2070_v55 = vmul.f32 1.442695, %v2068_v54 }
0x10ed   :  { %3954 = vpow2.f32 %v2070_v55 }
0x10f8   :  { %v3953_v56 = vpop.eup %3952 }
0x10f9   :  { %v2077_v57 = vsel %vm671_vm6, %v3953_v56, 0.0 }
0x10fa   :  { %v3955_v58 = vpop.eup %3954  ;;  %2078 = vadd.xlane.f32.xlu1 %v2077_v57 }
0x10fb   :  { %v2074_v59 = vsel %vm667_vm7, %v3955_v58, 0.0 }
0x10fc   :  { %2075 = vadd.xlane.f32.xlu0 %v2074_v59 }
0x1183   :  { %v2079_v61 = vpop.xlane.xlu1 %2078 }
0x1184   :  { %3956 = vrcp.f32 %v2079_v61 }
0x1185   :  { %v2076_v63 = vpop.xlane.xlu0 %2075 }
0x1186   :  { %3958 = vrcp.f32 %v2076_v63 }
0x1191   :  { %v3957_v0 = vpop.eup %3956 }
0x1192   :  { %v2083_v5 = vmul.f32 %v3957_v0, %v3953_v56 }
0x1193   :  { %v3959_v2 = vpop.eup %3958 }
0x1194   :  { %v2082_v4 = vmul.f32 %v3959_v2, %v3955_v58  ;;  %v3369_v58 = vld [vmem:[%s4891_s15 + $0x1] ss:$0 sm:$0xff] }
0x1196   :  { %3781 = vmatprep.mubr.msk.f32.mxu1 %vm667_vm7, %v2082_v4 }
0x1197   :  { %3782 = vmatmul.mubr.msk.f32.vlgmr.msra.gmra.mxu1 %vm667_vm7, %v2083_v5 }
0x1198   :  { %3785 = vmatpush3.msra.mxu1 %v3305_v60  ;;  %3792 = vmatprep.mubr.msk.f32.mxu1 %vm189_vm1, %v4593_v11 }
0x1199   :  { %3786 = vmatprep.subr.mxu1 %v3304_v7 }
0x119a   :  { %3787 = vmatpush3.msra.mxu1 %v3304_v7 }
0x119b   :  { %3788 = vmatprep.subr.mxu1 %v3303_v9 }
0x119c   :  { %3789 = vmatpush3.msra.mxu1 %v3303_v9 }
0x119d   :  { %3790 = vmatprep.subr.mxu1 %v3302_v10 }
0x119e   :  { %3791 = vmatpush3.msra.mxu1 %v3302_v10 }
0x119f   :  { %3793 = vmatmul.mubr.msk.f32.vlgmr.msra.gmra.mxu1 %vm189_vm1, %v4595_v12  ;;  %3806 = vmatprep.subr.mxu1 %v3321_v13 }
0x11a0   :  { %3807 = vmatpush3.msra.mxu1 %v3321_v13  ;;  %3814 = vmatprep.mubr.msk.f32.mxu1 %vm189_vm1, %v4593_v11 }
0x11a1   :  { %3808 = vmatprep.subr.mxu1 %v3320_v14 }
0x11a2   :  { %3809 = vmatpush3.msra.mxu1 %v3320_v14 }
0x11a3   :  { %3810 = vmatprep.subr.mxu1 %v3319_v15 }
0x11a4   :  { %3811 = vmatpush3.msra.mxu1 %v3319_v15 }
0x11a5   :  { %3812 = vmatprep.subr.mxu1 %v3318_v16 }
0x11a6   :  { %3813 = vmatpush3.msra.mxu1 %v3318_v16 }
0x11a7   :  { %3815 = vmatmul.mubr.msk.f32.vlgmr.msra.gmra.mxu1 %vm189_vm1, %v4595_v12 }
0x1257   :  { %v3783_v17 = vpop.f32.mrf.mxu1 }
0x1259   :  { %v2159_v18 = vpop.f32.mrf.mxu1 }
0x125f   :  { %v3794_v11 = vpop.f32.mrf.mxu1 }
0x1260   :  { %v2246_v22 = vadd.f32 %v3794_v11, %v3348_v19  ;;  %v3375_v11 = vld [vmem:[%s4894_s18 + $0x28] sm:$0xff] }
0x1261   :  { %v2240_v20 = vpop.f32.mrf.mxu1 }
0x1262   :  { %v2241_v21 = vadd.f32 %v3348_v19, %v2240_v20  ;;  %v3374_v19 = vld [vmem:[%s4894_s18 + $0x20] sm:$0xff] }
0x1264   :  { %3821 = vmatprep.mubr.msk.f32.mxu0 %vm579_vm4, %v2241_v21 }
0x1265   :  { %3822 = vmatmul.mubr.msk.f32.vlgmr.msra.gmra.mxu0 %vm579_vm4, %v2246_v22 }
0x1266   :  { %3832 = vmatpush3.msra.mxu0 %v3331_v45  ;;  %v3390_v45 = vld [vmem:[%s4896_s20 + $0xb0] sm:$0xff] }
0x1267   :  { %v3816_v24 = vpop.f32.mrf.mxu1  ;;  %3833 = vmatprep.subr.mxu0 %v3330_v50 }
0x1268   :  { %v2408_v12 = vadd.f32 %v3816_v24, %v3354_v23  ;;  %3834 = vmatpush3.msra.mxu0 %v3330_v50 }
0x1269   :  { %v2402_v25 = vpop.f32.mrf.mxu1 }
0x126a   :  { %v2403_v26 = vadd.f32 %v3354_v23, %v2402_v25  ;;  %3824 = vmatprep.subr.msk.mxu1 %vm697_vm5, %v2408_v12 }
0x126b   :  { %3825 = vmatpush3.msk.msra.mxu1 %vm697_vm5, %v2408_v12 }
0x126c   :  { %3826 = vmatprep.subr.mxu1 %v2403_v26 }
0x126d   :  { %3827 = vmatpush3.msra.mxu1 %v2403_v26  ;;  %v3372_v26 = vld [vmem:[%s4892_s16 + $0x1] ss:$0 sm:$0xff] }
0x126e   :  { %3838 = vmatprep.subr.mxu1 %v3329_v44 }
0x1325   :  { %v3823_v28 = vpop.f32.mrf.mxu0 }
0x1326   :  { %v2495_v30 = vadd.f32 %v3823_v28, %v4384_v6 }
0x1327   :  { %v2489_v31 = vpop.f32.mrf.mxu0 }
0x1328   :  { %v2490_v32 = vadd.f32 %v2489_v31, %v4389_v8  ;;  %v2501_v33 = vsel %vm671_vm6, %v2495_v30, -inf }
0x1329   :  { %2502 = vmax.xlane.f32.xlu1 %v2501_v33  ;;  %v3373_v33 = vld [vmem:[%s4893_s17 + $0x1] ss:$0 sm:$0xff]  ;;  %s4006_s17 = smov [#allocation3]  }
0x132a   :  { %v2498_v34 = vsel %vm667_vm7, %v2490_v32, -inf  ;;  %s3236_s7 = sshll.u32 %s4006_s17, 4  ;;  %s3237_s7 = int_to_ptr.vmem [resolvable:$true] %s3236_s7 }
0x132b   :  { %2499 = vmax.xlane.f32.xlu0 %v2498_v34  ;;  %p3987_p1 = scmp.lt.s32.totalorder %s3237_s7, %s3237_s7 }
0x13b2   :  { %v2503_v3 = vpop.xlane.xlu1 %2502 }
0x13b3   :  { %v2505_v35 = vsub.f32 %v2495_v30, %v2503_v3 }
0x13b4   :  { %v2500_v36 = vpop.xlane.xlu0 %2499 }
0x13b5   :  { %v2508_v37 = vmul.f32 1.442695, %v2505_v35  ;;  %v2504_v62 = vsub.f32 %v2490_v32, %v2500_v36  ;;  %v3399_v36 = vld [vmem:[%s4896_s20 + $0xf8] sm:$0xff] }
0x13b7   :  { %3960 = vpow2.f32 %v2508_v37  ;;  %v2506_v41 = vmul.f32 1.442695, %v2504_v62  ;;  %v3398_v37 = vld [vmem:[%s4896_s20 + $0xf0] sm:$0xff]  ;;  %v3397_v62 = vld [vmem:[%s4896_s20 + $0xe8] sm:$0xff] }
0x13b9   :  { %3962 = vpow2.f32 %v2506_v41  ;;  %v3396_v41 = vld [vmem:[%s4896_s20 + $0xe0] sm:$0xff] }
0x13c4   :  { %v3961_v42 = vpop.eup %3960 }
0x13c5   :  { %v2513_v6 = vsel %vm671_vm6, %v3961_v42, 0.0 }
0x13c6   :  { %v3963_v43 = vpop.eup %3962  ;;  %2514 = vadd.xlane.f32.xlu1 %v2513_v6  ;;  %v3394_v6 = vld [vmem:[%s4896_s20 + $0xd0] sm:$0xff] }
0x13c7   :  { %v2510_v8 = vsel %vm667_vm7, %v3963_v43, 0.0 }
0x13c8   :  { %2511 = vadd.xlane.f32.xlu0 %v2510_v8  ;;  %v3392_v8 = vld [vmem:[%s4896_s20 + $0xc0] sm:$0xff] }
0x144f   :  { %v2515_v46 = vpop.xlane.xlu1 %2514 }
0x1450   :  { %3964 = vrcp.f32 %v2515_v46  ;;  %v3389_v46 = vld [vmem:[%s4896_s20 + $0xa8] sm:$0xff] }
0x1451   :  { %v2512_v27 = vpop.xlane.xlu0 %2511 }
0x1452   :  { %3966 = vrcp.f32 %v2512_v27  ;;  %v3388_v27 = vld [vmem:[%s4896_s20 + $0xa0] sm:$0xff] }
0x145d   :  { %v3965_v47 = vpop.eup %3964 }
0x145e   :  { %v2519_v29 = vmul.f32 %v3965_v47, %v3961_v42  ;;  %v3395_v42 = vld [vmem:[%s4896_s20 + $0xd8] sm:$0xff] }
0x145f   :  { %v3967_v48 = vpop.eup %3966  ;;  %v3387_v47 = vld [vmem:[%s4896_s20 + $0x98] sm:$0xff] }
0x1460   :  { %v2518_v49 = vmul.f32 %v3967_v48, %v3963_v43  ;;  %v3393_v43 = vld [vmem:[%s4896_s20 + $0xc8] sm:$0xff]  ;;  %v3386_v48 = vld [vmem:[%s4896_s20 + $0x90] sm:$0xff] }
0x1462   :  { %3828 = vmatprep.mubr.msk.f32.mxu1 %vm667_vm7, %v2518_v49  ;;  %v3385_v49 = vld [vmem:[%s4896_s20 + $0x88] sm:$0xff] }
0x1463   :  { %3829 = vmatmul.mubr.msk.f32.vlgmr.msra.gmra.mxu1 %vm667_vm7, %v2519_v29  ;;  %v3384_v29 = vld [vmem:[%s4896_s20 + $0x80] sm:$0xff] }
0x1464   :  { %3839 = vmatpush3.msra.mxu1 %v3329_v44  ;;  %3842 = vmatprep.mubr.msk.f32.mxu1 %vm579_vm4, %v2159_v18  ;;  %v3376_v18 = vld [vmem:[%s4894_s18 + $0x30] sm:$0xff]  ;;  %v3391_v44 = vld [vmem:[%s4896_s20 + $0xb8] sm:$0xff] }
0x1465   :  { %3840 = vmatprep.subr.mxu1 %v3328_v40 }
0x1466   :  { %3841 = vmatpush3.msra.mxu1 %v3328_v40  ;;  %v3379_v40 = vld [vmem:[%s4895_s19 + $0x1] ss:$0 sm:$0xff] }
0x1467   :  { %3843 = vmatmul.mubr.msk.f32.vlgmr.msra.gmra.mxu1 %vm579_vm4, %v3783_v17  ;;  %v3377_v17 = vld [vmem:[%s4894_s18 + $0x38] sm:$0xff]  ;;  %3856 = vmatprep.subr.mxu1 %v3399_v36 }
0x1468   :  { %3845 = vmatprep.subr.mxu0 %v3377_v17  ;;  %3857 = vmatpush3.msra.mxu1 %v3399_v36  ;;  %v3405_v36 = vld [vmem:[%s4902_s26] ss:$0 sm:$0xff] }
0x1469   :  { %3858 = vmatprep.subr.mxu1 %v3398_v37 }
0x146a   :  { %3859 = vmatpush3.msra.mxu1 %v3398_v37 }
0x146b   :  { %3860 = vmatprep.subr.mxu1 %v3397_v62 }
0x146c   :  { %3861 = vmatpush3.msra.mxu1 %v3397_v62 }
0x146d   :  { %3862 = vmatprep.subr.mxu1 %v3396_v41 }
0x146e   :  { %3863 = vmatpush3.msra.mxu1 %v3396_v41 }
0x146f   :  { %3864 = vmatprep.subr.mxu1 %v3395_v42 }
0x1470   :  { %3865 = vmatpush3.msra.mxu1 %v3395_v42 }
0x1471   :  { %3866 = vmatprep.subr.mxu1 %v3394_v6 }
0x1472   :  { %3867 = vmatpush3.msra.mxu1 %v3394_v6 }
0x1473   :  { %3868 = vmatprep.subr.mxu1 %v3393_v43 }
0x1474   :  { %3869 = vmatpush3.msra.mxu1 %v3393_v43 }
0x1475   :  { %3870 = vmatprep.subr.mxu1 %v3392_v8 }
0x1476   :  { %3871 = vmatpush3.msra.mxu1 %v3392_v8 }
0x1477   :  { %3872 = vmatprep.subr.mxu1 %v3391_v44 }
0x1478   :  { %3873 = vmatpush3.msra.mxu1 %v3391_v44 }
0x1479   :  { %3874 = vmatprep.subr.mxu1 %v3390_v45 }
0x147a   :  { %3875 = vmatpush3.msra.mxu1 %v3390_v45 }
0x147b   :  { %3876 = vmatprep.subr.mxu1 %v3389_v46 }
0x147c   :  { %3877 = vmatpush3.msra.mxu1 %v3389_v46 }
0x147d   :  { %3878 = vmatprep.subr.mxu1 %v3388_v27 }
0x147e   :  { %3879 = vmatpush3.msra.mxu1 %v3388_v27 }
0x147f   :  { %3880 = vmatprep.subr.mxu1 %v3387_v47 }
0x1480   :  { %3881 = vmatpush3.msra.mxu1 %v3387_v47 }
0x1481   :  { %3882 = vmatprep.subr.mxu1 %v3386_v48 }
0x1482   :  { %3883 = vmatpush3.msra.mxu1 %v3386_v48 }
0x1483   :  { %3884 = vmatprep.subr.mxu1 %v3385_v49 }
0x1484   :  { %3885 = vmatpush3.msra.mxu1 %v3385_v49 }
0x1485   :  { %3886 = vmatprep.subr.mxu1 %v3384_v29 }
0x1486   :  { %3887 = vmatpush3.msra.mxu1 %v3384_v29 }
0x1523   :  { %v3830_v51 = vpop.f32.mrf.mxu1 }
0x1525   :  { %v2595_v52 = vpop.f32.mrf.mxu1 }
0x1526   :  { %3835 = vmatprep.mubr.msk.f32.mxu0 %vm579_vm4, %v2595_v52 }
0x1527   :  { %3836 = vmatmul.mubr.msk.f32.vlgmr.msra.gmra.mxu0 %vm579_vm4, %v3830_v51  ;;  %v3844_v53 = vpop.f32.mrf.mxu1 }
0x1528   :  { %3846 = vmatpush3.msra.mxu0 %v3377_v17 }
0x1529   :  { %v2757_v56 = vpop.f32.mrf.mxu1  ;;  %3847 = vmatprep.subr.mxu0 %v3376_v18 }
0x152a   :  { %3848 = vmatpush3.msra.mxu0 %v3376_v18 }
0x152b   :  { %3849 = vmatprep.subr.mxu0 %v3375_v11 }
0x152c   :  { %3850 = vmatpush3.msra.mxu0 %v3375_v11 }
0x152d   :  { %3851 = vmatprep.subr.mxu0 %v3374_v19 }
0x152e   :  { %3852 = vmatpush3.msra.mxu0 %v3374_v19 }
0x152f   :  { %3891 = vmatprep.subr.mxu0 %v4004_v1 }
0x15e7   :  { %v3837_v54 = vpop.f32.mrf.mxu0 }
0x15e8   :  { %v2763_v55 = vadd.f32 %v3844_v53, %v3837_v54 }
0x15e9   :  { %v2676_v57 = vpop.f32.mrf.mxu0 }
0x15ea   :  { %v2767_v59 = vadd.f32 %v2763_v55, %v4559_v39  ;;  %v2758_v60 = vadd.f32 %v2757_v56, %v2676_v57 }
0x15ec   :  { %v2766_v61 = vadd.f32 %v2758_v60, %v4562_v38  ;;  %v2777_v63 = vadd.f32 %v3369_v58, %v2767_v59 }
0x15ee   :  { %v2785_v0 = vsel %vm191_vm2, %v2777_v63, 0.0  ;;  %v4750_v2 = vadd.f32 %v3369_v58, %v2766_v61 }
0x15ef   :  { %2786 = vadd.xlane.f32.xlu1 %v2785_v0 }
0x15f0   :  { %v2782_v4 = vsel %vm189_vm1, %v4750_v2, 0.0 }
0x15f1   :  { %2783 = vadd.xlane.f32.xlu0 %v2782_v4 }
0x1678   :  { %v2787_v5 = vpop.xlane.xlu1 %2786 }
0x1679   :  { %v2789_v7 = vmul.f32 0.03125, %v2787_v5 }
0x167a   :  { %v2784_v9 = vpop.xlane.xlu0 %2783 }
0x167b   :  { %v2791_v10 = vsub.f32 %v2777_v63, %v2789_v7  ;;  %v2788_v13 = vmul.f32 0.03125, %v2784_v9 }
0x167d   :  { %v2790_v39 = vsub.f32 %v4750_v2, %v2788_v13  ;;  %v2793_v14 = vmul.f32 %v2791_v10, %v2791_v10 }
0x167f   :  { %v2797_v38 = vsel %vm191_vm2, %v2793_v14, 0.0  ;;  %v2792_v15 = vmul.f32 %v2790_v39, %v2790_v39 }
0x1680   :  { %2798 = vadd.xlane.f32.xlu1 %v2797_v38 }
0x1681   :  { %v2794_v16 = vsel %vm189_vm1, %v2792_v15, 0.0 }
0x1682   :  { %2795 = vadd.xlane.f32.xlu0 %v2794_v16 }
0x1709   :  { %v2799_v20 = vpop.xlane.xlu1 %2798 }
0x170a   :  { %v2801_v21 = vmul.f32 0.03125, %v2799_v20  ;;  %v3072_v20 = vld [vmem:[%s4900_s24 + $0x18] sm:$0xff] }
0x170b   :  { %v2796_v22 = vpop.xlane.xlu0 %2795 }
0x170c   :  { %v2803_v23 = vadd.f32 1e-05, %v2801_v21  ;;  %v2800_v24 = vmul.f32 0.03125, %v2796_v22  ;;  %v3070_v21 = vld [vmem:[%s4900_s24 + $0x8] sm:$0xff]  ;;  %v3069_v22 = vld [vmem:[%s4900_s24] sm:$0xff] }
0x170e   :  { %3968 = vrsqrt.f32 %v2803_v23  ;;  %v2802_v12 = vadd.f32 1e-05, %v2800_v24 }
0x1710   :  { %3970 = vrsqrt.f32 %v2802_v12 }
0x171b   :  { %v3969_v25 = vpop.eup %3968 }
0x171c   :  { %v2807_v28 = vmul.f32 %v3969_v25, %v2791_v10  ;;  %v3401_v10 = vld [vmem:[%s4897_s21 + $0x1] ss:$0 sm:$0xff] }
0x171d   :  { %v3971_v30 = vpop.eup %3970 }
0x171e   :  { %v2806_v31 = vmul.f32 %v3971_v30, %v2790_v39  ;;  %v2815_v32 = vmul.f32 %v3372_v26, %v2807_v28  ;;  %v3403_v30 = vld [vmem:[%s4899_s23] ss:$0 sm:$0xff] }
0x1720   :  { %v2814_v34 = vmul.f32 %v3372_v26, %v2806_v31  ;;  %v2823_v35 = vadd.f32 %v3373_v33, %v2815_v32  ;;  %v3402_v26 = vld [vmem:[%s4898_s22] ss:$0 sm:$0xff] }
0x1722   :  { %v2822_v3 = vadd.f32 %v3373_v33, %v2814_v34  ;;  %v3147_v33 = vld [vmem:[%s4901_s25 + $0x8] sm:$0xff]  ;;  %v3146_v34 = vld [vmem:[%s4901_s25] sm:$0xff]  ;;  %s3982_s25 = scalar_lea.vmem %s3237_s7, 32 }
0x1723   :  { %p3983_p0 = scmp.ne.s32.totalorder %s3237_s7, %s3982_s25  ;;  %p3988_p2 = scmp.lt.s32.totalorder %s3982_s25, %s3982_s25 }
0x1724   :  { %3853 = vmatprep.mubr.msk.f32.mxu0 %vm189_vm1, %v2822_v3 }
0x1725   :  { %3854 = vmatmul.mubr.msk.f32.vlgmr.msra.gmra.mxu0 %vm189_vm1, %v2823_v35  ;;  %p3989_p3 = por %p3988_p2, %p3987_p1 }
0x1726   :  { %3892 = vmatpush3.msra.mxu0 %v3072_v20  ;;  %3899 = vmatprep.mubr.msk.f32.mxu0 %vm4005_vm9, %v4004_v1 }
0x1727   :  { %3893 = vmatprep.subr.mxu0 %v4004_v1  ;;  %p3990_p4 = pnand %p3989_p3, %p3983_p0 }
0x17e5   :  { %v3855_v50 = vpop.f32.mrf.mxu0 }
0x17e6   :  { %v2915_v51 = vadd.f32 %v3855_v50, %v3379_v40 }
0x17e7   :  { %v2909_v52 = vpop.f32.mrf.mxu0 }
0x17e8   :  { %v3383_v53 = vmul.f32 -1.702, %v2915_v51  ;;  %v2910_v54 = vadd.f32 %v3379_v40, %v2909_v52 }
0x17ea   :  { %v2924_v55 = vmul.f32 1.442695, %v3383_v53  ;;  %v3382_v56 = vmul.f32 -1.702, %v2910_v54 }
0x17ec   :  { %3972 = vpow2.f32 %v2924_v55  ;;  %v2922_v57 = vmul.f32 1.442695, %v3382_v56 }
0x17ee   :  { %3974 = vpow2.f32 %v2922_v57 }
0x17f9   :  { %v3973_v58 = vpop.eup %3972 }
0x17fa   :  { %v2927_v59 = vadd.f32 1.0, %v3973_v58 }
0x17fb   :  { %v3975_v60 = vpop.eup %3974 }
0x17fc   :  { %v2926_v61 = vadd.f32 1.0, %v3975_v60  ;;  %3976 = vrcp.f32 %v2927_v59 }
0x17fe   :  { %3978 = vrcp.f32 %v2926_v61 }
0x1809   :  { %v3977_v63 = vpop.eup %3976 }
0x180a   :  { %v2933_v5 = vmul.f32 %v3977_v63, %v2915_v51 }
0x180b   :  { %v3979_v0 = vpop.eup %3978 }
0x180c   :  { %v2932_v4 = vmul.f32 %v3979_v0, %v2910_v54 }
0x180e   :  { %3888 = vmatprep.mubr.f32.mxu1 %v2932_v4 }
0x180f   :  { %3889 = vmatmul.mubr.f32.vlgmr.msra.gmra.mxu1 %v2933_v5 }
0x18cf   :  { %v3890_v7 = vpop.f32.mrf.mxu1 }
0x18d1   :  { %v3017_v9 = vpop.f32.mrf.mxu1 }
0x18d2   :  { %v3025_v13 = vadd.f32 %v3017_v9, %v4750_v2  ;;  %v3071_v2 = vld [vmem:[%s4900_s24 + $0x10] sm:$0xff] }
0x18d3   :  { %3894 = vmatpush3.msra.mxu0 %v3071_v2 }
0x18d4   :  { %v3034_v39 = vadd.f32 %v3401_v10, %v3025_v13  ;;  %3895 = vmatprep.subr.mxu0 %v4004_v1 }
0x18d5   :  { %3896 = vmatpush3.msra.mxu0 %v3070_v21 }
0x18d6   :  { %v3036_v14 = vrot.slane %v3034_v39, 4  ;;  %3897 = vmatprep.subr.mxu0 %v4004_v1 }
0x18d7   :  { %3898 = vmatpush3.msra.mxu0 %v3069_v22 }
0x18d8   :  { %v3039_v38 = vsel %vm3038_vm8, %v3034_v39, %v3036_v14  ;;  %3902 = vmatprep.subr.mxu0 %v4004_v1 }
0x18d9   :  { %v3042_v15 = vsel %vm191_vm2, %v3039_v38, 0.0 }
0x18da   :  { %3043 = vadd.xlane.f32.xlu0 %v3042_v15 }
0x1963   :  { %v3044_v16 = vpop.xlane.xlu0 %3043 }
0x1964   :  { %v3045_v17 = vmul.f32 0.03125, %v3044_v16 }
0x1966   :  { %v3046_v18 = vsub.f32 %v3039_v38, %v3045_v17 }
0x1968   :  { %v3047_v11 = vmul.f32 %v3046_v18, %v3046_v18 }
0x196a   :  { %v3048_v19 = vsel %vm191_vm2, %v3047_v11, 0.0 }
0x196b   :  { %3049 = vadd.xlane.f32.xlu1 %v3048_v19 }
0x19f4   :  { %v3050_v23 = vpop.xlane.xlu1 %3049 }
0x19f5   :  { %v3051_v24 = vmul.f32 0.03125, %v3050_v23 }
0x19f7   :  { %v3052_v12 = vadd.f32 1e-05, %v3051_v24 }
0x19f9   :  { %3980 = vrsqrt.f32 %v3052_v12 }
0x1a06   :  { %v3981_v25 = vpop.eup %3980 }
0x1a07   :  { %v3054_v28 = vmul.f32 %v3981_v25, %v3046_v18 }
0x1a09   :  { %v3061_v31 = vmul.f32 %v3402_v26, %v3054_v28 }
0x1a0b   :  { %v3068_v32 = vadd.f32 %v3403_v30, %v3061_v31 }
0x1a0d   :  { %3900 = vmatmul.mubr.msk.f32.vlgmr.msra.gmra.mxu0 %vm189_vm1, %v3068_v32 }
0x1a0e   :  { %3903 = vmatpush3.msra.mxu0 %v3147_v33  ;;  %3906 = vmatprep.mubr.msk.f32.mxu0 %vm4005_vm9, %v4004_v1 }
0x1a0f   :  { %3904 = vmatprep.subr.mxu0 %v4004_v1 }
0x1a10   :  { %3905 = vmatpush3.msra.mxu0 %v3146_v34 }
0x1acd   :  { %v3142_v3 = vpop.f32.mrf.mxu0 }
0x1ace   :  { %3907 = vmatmul.mubr.msk.f32.vlgmr.msra.gmra.mxu0 %vm579_vm4, %v3142_v3 }
0x1acf   :  { %v3901_v35 = vpop.f32.mrf.mxu0 }
0x1b8e   :  { %v3224_v37 = vpop.f32.mrf.mxu0 }
0x1b8f   :  { %v3225_v62 = vadd.f32 %v3405_v36, %v3224_v37 }
0x1b90   :  { %v3908_v41 = vpop.f32.mrf.mxu0 }
0x1b91   :  { %3229 = vst.msk [vmem:[#allocation3] sm:$0x3] %vm3228_vm10, %v3225_v62 }
0x1b92   :  { %3993 = shalt.err (!%p3990_p4)
}
0x1b93   :  { %3239 = dma.vmem_to_hbm [thread:$0]  %s3237_s7, 32, %s4903_s27, [#allocation4]  }
0x1b94   :  { %4002 = dma.done.wait [#allocation4], 32  }
0x1b95   :  { %4003 = vsyncadd [#allocation4], 4294967264 }
0x1b96   :  { %3243 = vsyncpa [#allocation4], 1 }

</bundles_post_ra>
